<compile_context>
chip_gen: v6e
topology: v6e:2x2x1
jax: 0.10.0
libtpu: 0.0.40
codegen_flags: <defaults>
</compile_context>

<pallas_src>
import math
from functools import partial

import jax
import jax.numpy as jnp
from jax import lax
from jax.experimental import pallas as pl
from jax.experimental.pallas import tpu as pltpu

# ----------------------------- config (small) ------------------------------
EMBED = 32
HEADS = 4                    # head split is a no-op under the reference einsum
NUM_LAYERS = 2
FWD_EXP = 4
FF_DIM = EMBED * FWD_EXP     # 128 == lane width
SRC_VOCAB = 20
TRG_VOCAB = 20
MAX_LEN = 16
SRC_PAD = 0
TRG_PAD = 0
EPS = 1e-5                   # nn.LayerNorm default eps
LANE = 128                   # lane-dense output width (fc_out padded to this)


# --------------------------- in-kernel math helpers -------------------------
def _dot(a, b):
    # bf16 at the MXU boundary (bf16-native MXU on v5e/v6e/v7x), f32 accumulation.
    return jnp.dot(a.astype(jnp.bfloat16), b.astype(jnp.bfloat16),
                   preferred_element_type=jnp.float32)


def _layer_norm(x, g, b):
    mean = jnp.mean(x, axis=-1, keepdims=True)
    var = jnp.mean(jnp.square(x - mean), axis=-1, keepdims=True)  # biased, like torch
    return (x - mean) * lax.rsqrt(var + EPS) * g + b


def _seg_reduce(n, l):
    """(n, n*l) 0/1 matrix: row b sums the l rows of batch b.  Built in-kernel."""
    r = lax.broadcasted_iota(jnp.int32, (n, n * l), 0)
    c = lax.broadcasted_iota(jnp.int32, (n, n * l), 1)
    return ((c >= r * l) & (c < (r + 1) * l)).astype(jnp.float32)


def _seg_bcast(n, l):
    """(n*l, n) 0/1 matrix: broadcasts one row per batch back over l query rows."""
    r = lax.broadcasted_iota(jnp.int32, (n * l, n), 0)
    c = lax.broadcasted_iota(jnp.int32, (n * l, n), 1)
    return ((r >= c * l) & (r < (c + 1) * l)).astype(jnp.float32)


def _attention(v_in, reduce_m, bcast_m, lv, ln_g, ln_b, wv, bv, wo, bo):
    """SelfAttention under the reference einsum semantics.

    out[n,q,:] = fc_out( sum over the value sequence of Linear_v(norm(v_in)) ),
    broadcast over q.  Q/K projections, masks and softmax cancel exactly
    (softmax row-sum == 1) and are omitted.  The projections run on the (N,E)
    per-batch sums, not on the full (N*L,E) streams.
    """
    nv = _layer_norm(v_in, ln_g, ln_b)
    s = _dot(reduce_m, nv)                 # (N, E): per-batch sum of LN'd value rows
    vs = _dot(s, wv) + float(lv) * bv      # == sum over sequence of Linear_v rows
    a = _dot(vs, wo) + bo                  # fc_out of the sum, (N, E)
    return _dot(bcast_m, a)                # broadcast back over the query rows


def _transformer_block(x_query, v_in, reduce_m, bcast_m, lv,
                       ln1_g, ln1_b, wv, bv, wo, bo,
                       ln2_g, ln2_b, w1, b1, w2, b2):
    attn = _attention(v_in, reduce_m, bcast_m, lv, ln1_g, ln1_b, wv, bv, wo, bo)
    x = x_query + attn                     # dropout(p=0) = identity
    f = _layer_norm(x, ln2_g, ln2_b)
    h = jnp.maximum(_dot(f, w1) + b1, 0.0)  # ReLU
    return x + _dot(h, w2) + b2


# ----------------------------- the fused Pallas kernel -----------------------
# vec-slab row layout (per layer), each row lane-padded to 128:
#   encoder (L, 8, 128): 0 ln1_g, 1 ln1_b, 2 bv, 3 bo, 4 ln2_g, 5 ln2_b, 6 b2, 7 b1
#   decoder (L,12, 128): 0 ln_g, 1 ln_b, 2 bv_s, 3 bo_s, 4 ln1_g, 5 ln1_b,
#                        6 bv_c, 7 bo_c, 8 ln2_g, 9 ln2_b, 10 b2, 11 b1
def _transformer_kernel(n, ls, lt,
                        xe_ref, xd_ref,
                        ewp, ew1, ew2, evec,
                        dwp, dw1, dw2, dvec,
                        fc, o_ref):
    E = EMBED
    # segment reduce / broadcast operators: built once in-kernel, no HBM operands
    enc_red, enc_bc = _seg_reduce(n, ls), _seg_bcast(n, ls)
    dec_red, dec_bc = _seg_reduce(n, lt), _seg_bcast(n, lt)

    def v(ref, l, i, w=E):                 # (1, w) lane-slice of a vec-slab row
        return ref[l, i:i + 1, 0:w]

    # -------- encoder: all layers, activations stay VMEM-resident --------
    x = xe_ref[...]                        # (N*Ls, E)
    for l in range(NUM_LAYERS):            # static unroll: one launch for everything
        x = _transformer_block(
            x, x, enc_red, enc_bc, ls,
            v(evec, l, 0), v(evec, l, 1),
            ewp[l, 0], v(evec, l, 2), ewp[l, 1], v(evec, l, 3),
            v(evec, l, 4), v(evec, l, 5),
            ew1[l], v(evec, l, 7, FF_DIM), ew2[l], v(evec, l, 6))
    enc_out = x                            # never written back to HBM

    # -------- decoder: all layers + fused, lane-dense fc_out --------
    y = xd_ref[...]                        # (N*Lt, E)
    for l in range(NUM_LAYERS):
        # decoder self-attention sub-block + residual (pre-norm on x only)
        attn = _attention(y, dec_red, dec_bc, lt,
                          v(dvec, l, 0), v(dvec, l, 1),
                          dwp[l, 0], v(dvec, l, 2), dwp[l, 1], v(dvec, l, 3))
        q = y + attn
        # cross "transformer block": value = key = encoder output, query = q
        y = _transformer_block(
            q, enc_out, enc_red, dec_bc, ls,
            v(dvec, l, 4), v(dvec, l, 5),
            dwp[l, 2], v(dvec, l, 6), dwp[l, 3], v(dvec, l, 7),
            v(dvec, l, 8), v(dvec, l, 9),
            dw1[l], v(dvec, l, 11, FF_DIM), dw2[l], v(dvec, l, 10))

    # lane-dense (N*Lt, 128) output block; wrapper slices [:, :TRG_VOCAB]
    o_ref[...] = _dot(y, fc[0:E, :]) + fc[E:E + 1, :]


# ------------------------------- call wrapper -------------------------------
def _full_spec(shape):
    nd = len(shape)
    return pl.BlockSpec(shape, lambda i: (0,) * nd)


def _embed(word_emb, pos_emb, tokens):
    # TODO(synk): embedding gathers could be fused via scalar-prefetch row gather;
    # left to XLA here (two tiny gathers off the latency-critical kernel).
    n, seq = tokens.shape
    x = jnp.take(word_emb, tokens, axis=0) + pos_emb[:seq][None]
    return x.reshape(n * seq, EMBED)


def transformer_forward(params, src, trg):
    # NOTE: src/trg padding masks and the causal mask have no observable effect
    # under the reference einsum semantics (see header note), so they are not
    # materialized or DMA'd.
    n, ls = src.shape
    _, lt = trg.shape
    enc_p, dec_p = params["enc"], params["dec"]

    xe = _embed(enc_p["word_emb"], enc_p["pos_emb"], src)          # (N*Ls, E)
    xd = _embed(dec_p["word_emb"], dec_p["pos_emb"], trg)          # (N*Lt, E)

    args = (xe, xd,
            enc_p["wproj"], enc_p["w1"], enc_p["w2"], enc_p["vec"],
            dec_p["wproj"], dec_p["w1"], dec_p["w2"], dec_p["vec"],
            dec_p["fc"])

    out = pl.pallas_call(
        partial(_transformer_kernel, n, ls, lt),
        out_shape=jax.ShapeDtypeStruct((n * lt, LANE), jnp.float32),
        grid=(1,),   # single step: whole problem + weights fit easily in VMEM
        in_specs=[_full_spec(a.shape) for a in args],
        out_specs=_full_spec((n * lt, LANE)),
        compiler_params=pltpu.CompilerParams(dimension_semantics=("arbitrary",)),
    )(*args)
    return out[:, :TRG_VOCAB].reshape(n, lt, TRG_VOCAB)


# ----------------------------- deterministic init ----------------------------
class KeyGen:
    def __init__(self, key):
        self.key = key

    def __call__(self):
        self.key, sub = jax.random.split(self.key)
        return sub


def _xavier(key, shape):
    fan_in, fan_out = shape[-2], shape[-1]
    limit = math.sqrt(6.0 / (fan_in + fan_out))
    return jax.random.uniform(key, shape, jnp.float32, -limit, limit)


def _bias(key, shape, fan_in):
    bound = 1.0 / math.sqrt(fan_in)
    return jax.random.uniform(key, shape, jnp.float32, -bound, bound)


def init_params(key):
    kg = KeyGen(key)
    L = NUM_LAYERS

    def lane_pad(v):                         # (L, k) -> (L, 1, 128)
        return jnp.pad(v, ((0, 0), (0, LANE - v.shape[-1])))[:, None, :]

    def vec_slab(*rows):                     # rows of (L, k) -> (L, n_rows, 128)
        return jnp.concatenate([lane_pad(r) for r in rows], axis=1)

    ones_e = jnp.ones((L, EMBED), jnp.float32)
    zeros_e = jnp.zeros((L, EMBED), jnp.float32)

    # The module's Q/K projection weights are provably dead parameters under the
    # reference einsum semantics (they never influence the output) → not created.
    # ---------------- encoder ----------------
    e_wv = _xavier(kg(), (L, EMBED, EMBED)); e_bv = _bias(kg(), (L, EMBED), EMBED)
    e_wo = _xavier(kg(), (L, EMBED, EMBED)); e_bo = _bias(kg(), (L, EMBED), EMBED)
    e_w1 = _xavier(kg(), (L, EMBED, FF_DIM)); e_b1 = _bias(kg(), (L, FF_DIM), EMBED)
    e_w2 = _xavier(kg(), (L, FF_DIM, EMBED)); e_b2 = _bias(kg(), (L, EMBED), FF_DIM)
    enc = {
        "word_emb": _xavier(kg(), (SRC_VOCAB, EMBED)),
        "pos_emb": _xavier(kg(), (MAX_LEN, EMBED)),
        "wproj": jnp.stack([e_wv, e_wo], axis=1),                    # (L,2,E,E)
        "w1": e_w1, "w2": e_w2,
        "vec": vec_slab(ones_e, zeros_e, e_bv, e_bo,                 # ln1, bv, bo
                        ones_e, zeros_e, e_b2, e_b1),                # ln2, b2, b1
    }

    # ---------------- decoder ----------------
    d_wvs = _xavier(kg(), (L, EMBED, EMBED)); d_bvs = _bias(kg(), (L, EMBED), EMBED)
    d_wos = _xavier(kg(), (L, EMBED, EMBED)); d_bos = _bias(kg(), (L, EMBED), EMBED)
    d_wvc = _xavier(kg(), (L, EMBED, EMBED)); d_bvc = _bias(kg(), (L, EMBED), EMBED)
    d_woc = _xavier(kg(), (L, EMBED, EMBED)); d_boc = _bias(kg(), (L, EMBED), EMBED)
    d_w1 = _xavier(kg(), (L, EMBED, FF_DIM)); d_b1 = _bias(kg(), (L, FF_DIM), EMBED)
    d_w2 = _xavier(kg(), (L, FF_DIM, EMBED)); d_b2 = _bias(kg(), (L, EMBED), FF_DIM)
    fc_w = _xavier(kg(), (EMBED, TRG_VOCAB))
    fc_b = _bias(kg(), (TRG_VOCAB,), EMBED)
    fc = jnp.concatenate(                                            # (E+1, 128)
        [jnp.pad(fc_w, ((0, 0), (0, LANE - TRG_VOCAB))),
         jnp.pad(fc_b, (0, LANE - TRG_VOCAB))[None, :]], axis=0)
    dec = {
        "word_emb": _xavier(kg(), (TRG_VOCAB, EMBED)),
        "pos_emb": _xavier(kg(), (MAX_LEN, EMBED)),
        "wproj": jnp.stack([d_wvs, d_wos, d_wvc, d_woc], axis=1),    # (L,4,E,E)
        "w1": d_w1, "w2": d_w2,
        "vec": vec_slab(ones_e, zeros_e, d_bvs, d_bos,               # self-attn
                        ones_e, zeros_e, d_bvc, d_boc,               # cross-attn
                        ones_e, zeros_e, d_b2, d_b1),                # ffn
        "fc": fc,
    }
    return {"enc": enc, "dec": dec}


# ----------------------------------- main ------------------------------------
if __name__ == "__main__":
    root = jax.random.PRNGKey(0)
    k_src, k_trg, k_par = jax.random.split(root, 3)

    N, L = 2, 8
    src = jax.random.randint(k_src, (N, L), 1, SRC_VOCAB, dtype=jnp.int32)
    trg = jax.random.randint(k_trg, (N, L), 1, TRG_VOCAB, dtype=jnp.int32)
    # a few pad tokens (note: masks provably do not affect the reference output)
    src = src.at[0, -2:].set(SRC_PAD)
    trg = trg.at[1, -1].set(TRG_PAD)

    params = init_params(k_par)

    fwd = jax.jit(transformer_forward)
    out = jax.block_until_ready(fwd(params, src, trg))

    assert out.shape == (N, L, TRG_VOCAB), out.shape
    assert bool(jnp.isfinite(out).all())
    print("KERNEL_OK")
</pallas_src>

<mosaic_0001>
module attributes {stable_mosaic.version = 11 : i64} {
  func.func @_transformer_kernel(%arg0: i32, %arg1: memref<16x32xf32, #tpu.memory_space<vmem>>, %arg2: memref<16x32xf32, #tpu.memory_space<vmem>>, %arg3: memref<2x2x32x32xf32, #tpu.memory_space<vmem>>, %arg4: memref<2x32x128xf32, #tpu.memory_space<vmem>>, %arg5: memref<2x128x32xf32, #tpu.memory_space<vmem>>, %arg6: memref<2x8x128xf32, #tpu.memory_space<vmem>>, %arg7: memref<2x4x32x32xf32, #tpu.memory_space<vmem>>, %arg8: memref<2x32x128xf32, #tpu.memory_space<vmem>>, %arg9: memref<2x128x32xf32, #tpu.memory_space<vmem>>, %arg10: memref<2x12x128xf32, #tpu.memory_space<vmem>>, %arg11: memref<33x128xf32, #tpu.memory_space<vmem>>, %arg12: memref<16x128xf32, #tpu.memory_space<vmem>>) attributes {dimension_semantics = [#tpu.dimension_semantics<arbitrary>], iteration_bounds = array<i64: 1>, scalar_prefetch = 0 : i64, scratch_operands = 0 : i64, tpu.core_type = #tpu.core_type<tc>, window_params = [{pipeline_mode = #tpu.pipeline_mode<synchronous>, transform_indices = @transform_0, window_bounds = array<i64: 16, 32>}, {pipeline_mode = #tpu.pipeline_mode<synchronous>, transform_indices = @transform_1, window_bounds = array<i64: 16, 32>}, {pipeline_mode = #tpu.pipeline_mode<synchronous>, transform_indices = @transform_2, window_bounds = array<i64: 2, 2, 32, 32>}, {pipeline_mode = #tpu.pipeline_mode<synchronous>, transform_indices = @transform_3, window_bounds = array<i64: 2, 32, 128>}, {pipeline_mode = #tpu.pipeline_mode<synchronous>, transform_indices = @transform_4, window_bounds = array<i64: 2, 128, 32>}, {pipeline_mode = #tpu.pipeline_mode<synchronous>, transform_indices = @transform_5, window_bounds = array<i64: 2, 8, 128>}, {pipeline_mode = #tpu.pipeline_mode<synchronous>, transform_indices = @transform_6, window_bounds = array<i64: 2, 4, 32, 32>}, {pipeline_mode = #tpu.pipeline_mode<synchronous>, transform_indices = @transform_7, window_bounds = array<i64: 2, 32, 128>}, {pipeline_mode = #tpu.pipeline_mode<synchronous>, transform_indices = @transform_8, window_bounds = array<i64: 2, 128, 32>}, {pipeline_mode = #tpu.pipeline_mode<synchronous>, transform_indices = @transform_9, window_bounds = array<i64: 2, 12, 128>}, {pipeline_mode = #tpu.pipeline_mode<synchronous>, transform_indices = @transform_10, window_bounds = array<i64: 33, 128>}, {pipeline_mode = #tpu.pipeline_mode<synchronous>, transform_indices = @transform_11, window_bounds = array<i64: 16, 128>}]} {
    %0 = tpu.iota {dimensions = array<i32: 0>} : vector<2x16xi32>
    %1 = tpu.iota {dimensions = array<i32: 1>} : vector<2x16xi32>
    %c8_i32 = arith.constant 8 : i32
    %2 = vector.broadcast %c8_i32 : i32 to vector<2x16xi32>
    %3 = arith.muli %0, %2 : vector<2x16xi32>
    %4 = arith.cmpi sge, %1, %3 : vector<2x16xi32>
    %c1_i32 = arith.constant 1 : i32
    %5 = vector.broadcast %c1_i32 : i32 to vector<2x16xi32>
    %6 = arith.addi %0, %5 : vector<2x16xi32>
    %c8_i32_0 = arith.constant 8 : i32
    %7 = vector.broadcast %c8_i32_0 : i32 to vector<2x16xi32>
    %8 = arith.muli %6, %7 : vector<2x16xi32>
    %9 = arith.cmpi slt, %1, %8 : vector<2x16xi32>
    %10 = arith.andi %4, %9 : vector<2x16xi1>
    %11 = arith.extui %10 : vector<2x16xi1> to vector<2x16xi32>
    %12 = arith.sitofp %11 : vector<2x16xi32> to vector<2x16xf32>
    %13 = tpu.iota {dimensions = array<i32: 0>} : vector<16x2xi32>
    %14 = tpu.iota {dimensions = array<i32: 1>} : vector<16x2xi32>
    %c8_i32_1 = arith.constant 8 : i32
    %15 = vector.broadcast %c8_i32_1 : i32 to vector<16x2xi32>
    %16 = arith.muli %14, %15 : vector<16x2xi32>
    %17 = arith.cmpi sge, %13, %16 : vector<16x2xi32>
    %c1_i32_2 = arith.constant 1 : i32
    %18 = vector.broadcast %c1_i32_2 : i32 to vector<16x2xi32>
    %19 = arith.addi %14, %18 : vector<16x2xi32>
    %c8_i32_3 = arith.constant 8 : i32
    %20 = vector.broadcast %c8_i32_3 : i32 to vector<16x2xi32>
    %21 = arith.muli %19, %20 : vector<16x2xi32>
    %22 = arith.cmpi slt, %13, %21 : vector<16x2xi32>
    %23 = arith.andi %17, %22 : vector<16x2xi1>
    %24 = arith.extui %23 : vector<16x2xi1> to vector<16x2xi32>
    %25 = arith.sitofp %24 : vector<16x2xi32> to vector<16x2xf32>
    %26 = tpu.iota {dimensions = array<i32: 0>} : vector<2x16xi32>
    %27 = tpu.iota {dimensions = array<i32: 1>} : vector<2x16xi32>
    %c8_i32_4 = arith.constant 8 : i32
    %28 = vector.broadcast %c8_i32_4 : i32 to vector<2x16xi32>
    %29 = arith.muli %26, %28 : vector<2x16xi32>
    %30 = arith.cmpi sge, %27, %29 : vector<2x16xi32>
    %c1_i32_5 = arith.constant 1 : i32
    %31 = vector.broadcast %c1_i32_5 : i32 to vector<2x16xi32>
    %32 = arith.addi %26, %31 : vector<2x16xi32>
    %c8_i32_6 = arith.constant 8 : i32
    %33 = vector.broadcast %c8_i32_6 : i32 to vector<2x16xi32>
    %34 = arith.muli %32, %33 : vector<2x16xi32>
    %35 = arith.cmpi slt, %27, %34 : vector<2x16xi32>
    %36 = arith.andi %30, %35 : vector<2x16xi1>
    %37 = arith.extui %36 : vector<2x16xi1> to vector<2x16xi32>
    %38 = arith.sitofp %37 : vector<2x16xi32> to vector<2x16xf32>
    %39 = tpu.iota {dimensions = array<i32: 0>} : vector<16x2xi32>
    %40 = tpu.iota {dimensions = array<i32: 1>} : vector<16x2xi32>
    %c8_i32_7 = arith.constant 8 : i32
    %41 = vector.broadcast %c8_i32_7 : i32 to vector<16x2xi32>
    %42 = arith.muli %40, %41 : vector<16x2xi32>
    %43 = arith.cmpi sge, %39, %42 : vector<16x2xi32>
    %c1_i32_8 = arith.constant 1 : i32
    %44 = vector.broadcast %c1_i32_8 : i32 to vector<16x2xi32>
    %45 = arith.addi %40, %44 : vector<16x2xi32>
    %c8_i32_9 = arith.constant 8 : i32
    %46 = vector.broadcast %c8_i32_9 : i32 to vector<16x2xi32>
    %47 = arith.muli %45, %46 : vector<16x2xi32>
    %48 = arith.cmpi slt, %39, %47 : vector<16x2xi32>
    %49 = arith.andi %43, %48 : vector<16x2xi1>
    %50 = arith.extui %49 : vector<16x2xi1> to vector<16x2xi32>
    %51 = arith.sitofp %50 : vector<16x2xi32> to vector<16x2xf32>
    %c0 = arith.constant 0 : index
    %c0_10 = arith.constant 0 : index
    %52 = vector.load %arg1[%c0, %c0_10] : memref<16x32xf32, #tpu.memory_space<vmem>>, vector<16x32xf32>
    %c0_11 = arith.constant 0 : index
    %c0_12 = arith.constant 0 : index
    %c0_13 = arith.constant 0 : index
    %53 = vector.load %arg6[%c0_11, %c0_12, %c0_13] : memref<2x8x128xf32, #tpu.memory_space<vmem>>, vector<1x1x32xf32>
    %54 = vector.shape_cast %53 : vector<1x1x32xf32> to vector<1x32xf32>
    %c0_14 = arith.constant 0 : index
    %c1 = arith.constant 1 : index
    %c0_15 = arith.constant 0 : index
    %55 = vector.load %arg6[%c0_14, %c1, %c0_15] : memref<2x8x128xf32, #tpu.memory_space<vmem>>, vector<1x1x32xf32>
    %56 = vector.shape_cast %55 : vector<1x1x32xf32> to vector<1x32xf32>
    %c0_16 = arith.constant 0 : index
    %c0_17 = arith.constant 0 : index
    %c0_18 = arith.constant 0 : index
    %c0_19 = arith.constant 0 : index
    %57 = vector.load %arg3[%c0_16, %c0_17, %c0_18, %c0_19] : memref<2x2x32x32xf32, #tpu.memory_space<vmem>>, vector<1x1x32x32xf32>
    %58 = vector.shape_cast %57 : vector<1x1x32x32xf32> to vector<32x32xf32>
    %c0_20 = arith.constant 0 : index
    %c2 = arith.constant 2 : index
    %c0_21 = arith.constant 0 : index
    %59 = vector.load %arg6[%c0_20, %c2, %c0_21] : memref<2x8x128xf32, #tpu.memory_space<vmem>>, vector<1x1x32xf32>
    %60 = vector.shape_cast %59 : vector<1x1x32xf32> to vector<1x32xf32>
    %c0_22 = arith.constant 0 : index
    %c1_23 = arith.constant 1 : index
    %c0_24 = arith.constant 0 : index
    %c0_25 = arith.constant 0 : index
    %61 = vector.load %arg3[%c0_22, %c1_23, %c0_24, %c0_25] : memref<2x2x32x32xf32, #tpu.memory_space<vmem>>, vector<1x1x32x32xf32>
    %62 = vector.shape_cast %61 : vector<1x1x32x32xf32> to vector<32x32xf32>
    %c0_26 = arith.constant 0 : index
    %c3 = arith.constant 3 : index
    %c0_27 = arith.constant 0 : index
    %63 = vector.load %arg6[%c0_26, %c3, %c0_27] : memref<2x8x128xf32, #tpu.memory_space<vmem>>, vector<1x1x32xf32>
    %64 = vector.shape_cast %63 : vector<1x1x32xf32> to vector<1x32xf32>
    %c0_28 = arith.constant 0 : index
    %c4 = arith.constant 4 : index
    %c0_29 = arith.constant 0 : index
    %65 = vector.load %arg6[%c0_28, %c4, %c0_29] : memref<2x8x128xf32, #tpu.memory_space<vmem>>, vector<1x1x32xf32>
    %66 = vector.shape_cast %65 : vector<1x1x32xf32> to vector<1x32xf32>
    %c0_30 = arith.constant 0 : index
    %c5 = arith.constant 5 : index
    %c0_31 = arith.constant 0 : index
    %67 = vector.load %arg6[%c0_30, %c5, %c0_31] : memref<2x8x128xf32, #tpu.memory_space<vmem>>, vector<1x1x32xf32>
    %68 = vector.shape_cast %67 : vector<1x1x32xf32> to vector<1x32xf32>
    %c0_32 = arith.constant 0 : index
    %c0_33 = arith.constant 0 : index
    %c0_34 = arith.constant 0 : index
    %69 = vector.load %arg4[%c0_32, %c0_33, %c0_34] : memref<2x32x128xf32, #tpu.memory_space<vmem>>, vector<1x32x128xf32>
    %70 = vector.shape_cast %69 : vector<1x32x128xf32> to vector<32x128xf32>
    %c0_35 = arith.constant 0 : index
    %c7 = arith.constant 7 : index
    %c0_36 = arith.constant 0 : index
    %71 = vector.load %arg6[%c0_35, %c7, %c0_36] : memref<2x8x128xf32, #tpu.memory_space<vmem>>, vector<1x1x128xf32>
    %72 = vector.shape_cast %71 : vector<1x1x128xf32> to vector<1x128xf32>
    %c0_37 = arith.constant 0 : index
    %c0_38 = arith.constant 0 : index
    %c0_39 = arith.constant 0 : index
    %73 = vector.load %arg5[%c0_37, %c0_38, %c0_39] : memref<2x128x32xf32, #tpu.memory_space<vmem>>, vector<1x128x32xf32>
    %74 = vector.shape_cast %73 : vector<1x128x32xf32> to vector<128x32xf32>
    %c0_40 = arith.constant 0 : index
    %c6 = arith.constant 6 : index
    %c0_41 = arith.constant 0 : index
    %75 = vector.load %arg6[%c0_40, %c6, %c0_41] : memref<2x8x128xf32, #tpu.memory_space<vmem>>, vector<1x1x32xf32>
    %76 = vector.shape_cast %75 : vector<1x1x32xf32> to vector<1x32xf32>
    %cst = arith.constant dense<0.000000e+00> : vector<16xf32>
    %77 = vector.multi_reduction <add>, %52, %cst [1] : vector<16x32xf32> to vector<16xf32>
    %78 = vector.shape_cast %77 : vector<16xf32> to vector<16x1xf32>
    %cst_42 = arith.constant 3.200000e+01 : f32
    %79 = vector.broadcast %cst_42 : f32 to vector<16x1xf32>
    %80 = arith.divf %78, %79 : vector<16x1xf32>
    %81 = vector.broadcast %80 : vector<16x1xf32> to vector<16x32xf32>
    %82 = arith.subf %52, %81 : vector<16x32xf32>
    %83 = arith.mulf %82, %82 : vector<16x32xf32>
    %cst_43 = arith.constant dense<0.000000e+00> : vector<16xf32>
    %84 = vector.multi_reduction <add>, %83, %cst_43 [1] : vector<16x32xf32> to vector<16xf32>
    %85 = vector.shape_cast %84 : vector<16xf32> to vector<16x1xf32>
    %cst_44 = arith.constant 3.200000e+01 : f32
    %86 = vector.broadcast %cst_44 : f32 to vector<16x1xf32>
    %87 = arith.divf %85, %86 : vector<16x1xf32>
    %88 = vector.broadcast %80 : vector<16x1xf32> to vector<16x32xf32>
    %89 = arith.subf %52, %88 : vector<16x32xf32>
    %cst_45 = arith.constant 9.99999974E-6 : f32
    %90 = vector.broadcast %cst_45 : f32 to vector<16x1xf32>
    %91 = arith.addf %87, %90 : vector<16x1xf32>
    %92 = math.rsqrt %91 : vector<16x1xf32>
    %93 = vector.broadcast %92 : vector<16x1xf32> to vector<16x32xf32>
    %94 = arith.mulf %89, %93 : vector<16x32xf32>
    %95 = vector.broadcast %54 : vector<1x32xf32> to vector<16x32xf32>
    %96 = arith.mulf %94, %95 : vector<16x32xf32>
    %97 = vector.broadcast %56 : vector<1x32xf32> to vector<16x32xf32>
    %98 = arith.addf %96, %97 : vector<16x32xf32>
    %99 = arith.truncf %12 : vector<2x16xf32> to vector<2x16xbf16>
    %100 = arith.truncf %98 : vector<16x32xf32> to vector<16x32xbf16>
    %cst_46 = arith.constant dense<0.000000e+00> : vector<2x32xf32>
    %101 = tpu.matmul %99, %100, %cst_46 {dimension_numbers = #tpu.dot_dimension_numbers<[1], [0], [0], [1], [0, 0, 1, 1], [], []>} : vector<2x16xbf16>, vector<16x32xbf16>, vector<2x32xf32> -> vector<2x32xf32>
    %102 = arith.truncf %101 : vector<2x32xf32> to vector<2x32xbf16>
    %103 = arith.truncf %58 : vector<32x32xf32> to vector<32x32xbf16>
    %cst_47 = arith.constant dense<0.000000e+00> : vector<2x32xf32>
    %104 = tpu.matmul %102, %103, %cst_47 {dimension_numbers = #tpu.dot_dimension_numbers<[1], [0], [0], [1], [0, 0, 1, 1], [], []>} : vector<2x32xbf16>, vector<32x32xbf16>, vector<2x32xf32> -> vector<2x32xf32>
    %cst_48 = arith.constant 8.000000e+00 : f32
    %105 = vector.broadcast %cst_48 : f32 to vector<1x32xf32>
    %106 = arith.mulf %105, %60 : vector<1x32xf32>
    %107 = vector.broadcast %106 : vector<1x32xf32> to vector<2x32xf32>
    %108 = arith.addf %104, %107 : vector<2x32xf32>
    %109 = arith.truncf %108 : vector<2x32xf32> to vector<2x32xbf16>
    %110 = arith.truncf %62 : vector<32x32xf32> to vector<32x32xbf16>
    %cst_49 = arith.constant dense<0.000000e+00> : vector<2x32xf32>
    %111 = tpu.matmul %109, %110, %cst_49 {dimension_numbers = #tpu.dot_dimension_numbers<[1], [0], [0], [1], [0, 0, 1, 1], [], []>} : vector<2x32xbf16>, vector<32x32xbf16>, vector<2x32xf32> -> vector<2x32xf32>
    %112 = vector.broadcast %64 : vector<1x32xf32> to vector<2x32xf32>
    %113 = arith.addf %111, %112 : vector<2x32xf32>
    %114 = arith.truncf %25 : vector<16x2xf32> to vector<16x2xbf16>
    %115 = arith.truncf %113 : vector<2x32xf32> to vector<2x32xbf16>
    %cst_50 = arith.constant dense<0.000000e+00> : vector<16x32xf32>
    %116 = tpu.matmul %114, %115, %cst_50 {dimension_numbers = #tpu.dot_dimension_numbers<[1], [0], [0], [1], [0, 0, 1, 1], [], []>} : vector<16x2xbf16>, vector<2x32xbf16>, vector<16x32xf32> -> vector<16x32xf32>
    %117 = arith.addf %52, %116 : vector<16x32xf32>
    %cst_51 = arith.constant dense<0.000000e+00> : vector<16xf32>
    %118 = vector.multi_reduction <add>, %117, %cst_51 [1] : vector<16x32xf32> to vector<16xf32>
    %119 = vector.shape_cast %118 : vector<16xf32> to vector<16x1xf32>
    %cst_52 = arith.constant 3.200000e+01 : f32
    %120 = vector.broadcast %cst_52 : f32 to vector<16x1xf32>
    %121 = arith.divf %119, %120 : vector<16x1xf32>
    %122 = vector.broadcast %121 : vector<16x1xf32> to vector<16x32xf32>
    %123 = arith.subf %117, %122 : vector<16x32xf32>
    %124 = arith.mulf %123, %123 : vector<16x32xf32>
    %cst_53 = arith.constant dense<0.000000e+00> : vector<16xf32>
    %125 = vector.multi_reduction <add>, %124, %cst_53 [1] : vector<16x32xf32> to vector<16xf32>
    %126 = vector.shape_cast %125 : vector<16xf32> to vector<16x1xf32>
    %cst_54 = arith.constant 3.200000e+01 : f32
    %127 = vector.broadcast %cst_54 : f32 to vector<16x1xf32>
    %128 = arith.divf %126, %127 : vector<16x1xf32>
    %129 = vector.broadcast %121 : vector<16x1xf32> to vector<16x32xf32>
    %130 = arith.subf %117, %129 : vector<16x32xf32>
    %cst_55 = arith.constant 9.99999974E-6 : f32
    %131 = vector.broadcast %cst_55 : f32 to vector<16x1xf32>
    %132 = arith.addf %128, %131 : vector<16x1xf32>
    %133 = math.rsqrt %132 : vector<16x1xf32>
    %134 = vector.broadcast %133 : vector<16x1xf32> to vector<16x32xf32>
    %135 = arith.mulf %130, %134 : vector<16x32xf32>
    %136 = vector.broadcast %66 : vector<1x32xf32> to vector<16x32xf32>
    %137 = arith.mulf %135, %136 : vector<16x32xf32>
    %138 = vector.broadcast %68 : vector<1x32xf32> to vector<16x32xf32>
    %139 = arith.addf %137, %138 : vector<16x32xf32>
    %140 = arith.truncf %139 : vector<16x32xf32> to vector<16x32xbf16>
    %141 = arith.truncf %70 : vector<32x128xf32> to vector<32x128xbf16>
    %cst_56 = arith.constant dense<0.000000e+00> : vector<16x128xf32>
    %142 = tpu.matmul %140, %141, %cst_56 {dimension_numbers = #tpu.dot_dimension_numbers<[1], [0], [0], [1], [0, 0, 1, 1], [], []>} : vector<16x32xbf16>, vector<32x128xbf16>, vector<16x128xf32> -> vector<16x128xf32>
    %143 = vector.broadcast %72 : vector<1x128xf32> to vector<16x128xf32>
    %144 = arith.addf %142, %143 : vector<16x128xf32>
    %cst_57 = arith.constant 0.000000e+00 : f32
    %145 = vector.broadcast %cst_57 : f32 to vector<16x128xf32>
    %146 = arith.maximumf %144, %145 : vector<16x128xf32>
    %147 = arith.truncf %146 : vector<16x128xf32> to vector<16x128xbf16>
    %148 = arith.truncf %74 : vector<128x32xf32> to vector<128x32xbf16>
    %cst_58 = arith.constant dense<0.000000e+00> : vector<16x32xf32>
    %149 = tpu.matmul %147, %148, %cst_58 {dimension_numbers = #tpu.dot_dimension_numbers<[1], [0], [0], [1], [0, 0, 1, 1], [], []>} : vector<16x128xbf16>, vector<128x32xbf16>, vector<16x32xf32> -> vector<16x32xf32>
    %150 = arith.addf %117, %149 : vector<16x32xf32>
    %151 = vector.broadcast %76 : vector<1x32xf32> to vector<16x32xf32>
    %152 = arith.addf %150, %151 : vector<16x32xf32>
    %c1_59 = arith.constant 1 : index
    %c0_60 = arith.constant 0 : index
    %c0_61 = arith.constant 0 : index
    %153 = vector.load %arg6[%c1_59, %c0_60, %c0_61] : memref<2x8x128xf32, #tpu.memory_space<vmem>>, vector<1x1x32xf32>
    %154 = vector.shape_cast %153 : vector<1x1x32xf32> to vector<1x32xf32>
    %c1_62 = arith.constant 1 : index
    %c1_63 = arith.constant 1 : index
    %c0_64 = arith.constant 0 : index
    %155 = vector.load %arg6[%c1_62, %c1_63, %c0_64] : memref<2x8x128xf32, #tpu.memory_space<vmem>>, vector<1x1x32xf32>
    %156 = vector.shape_cast %155 : vector<1x1x32xf32> to vector<1x32xf32>
    %c1_65 = arith.constant 1 : index
    %c0_66 = arith.constant 0 : index
    %c0_67 = arith.constant 0 : index
    %c0_68 = arith.constant 0 : index
    %157 = vector.load %arg3[%c1_65, %c0_66, %c0_67, %c0_68] : memref<2x2x32x32xf32, #tpu.memory_space<vmem>>, vector<1x1x32x32xf32>
    %158 = vector.shape_cast %157 : vector<1x1x32x32xf32> to vector<32x32xf32>
    %c1_69 = arith.constant 1 : index
    %c2_70 = arith.constant 2 : index
    %c0_71 = arith.constant 0 : index
    %159 = vector.load %arg6[%c1_69, %c2_70, %c0_71] : memref<2x8x128xf32, #tpu.memory_space<vmem>>, vector<1x1x32xf32>
    %160 = vector.shape_cast %159 : vector<1x1x32xf32> to vector<1x32xf32>
    %c1_72 = arith.constant 1 : index
    %c1_73 = arith.constant 1 : index
    %c0_74 = arith.constant 0 : index
    %c0_75 = arith.constant 0 : index
    %161 = vector.load %arg3[%c1_72, %c1_73, %c0_74, %c0_75] : memref<2x2x32x32xf32, #tpu.memory_space<vmem>>, vector<1x1x32x32xf32>
    %162 = vector.shape_cast %161 : vector<1x1x32x32xf32> to vector<32x32xf32>
    %c1_76 = arith.constant 1 : index
    %c3_77 = arith.constant 3 : index
    %c0_78 = arith.constant 0 : index
    %163 = vector.load %arg6[%c1_76, %c3_77, %c0_78] : memref<2x8x128xf32, #tpu.memory_space<vmem>>, vector<1x1x32xf32>
    %164 = vector.shape_cast %163 : vector<1x1x32xf32> to vector<1x32xf32>
    %c1_79 = arith.constant 1 : index
    %c4_80 = arith.constant 4 : index
    %c0_81 = arith.constant 0 : index
    %165 = vector.load %arg6[%c1_79, %c4_80, %c0_81] : memref<2x8x128xf32, #tpu.memory_space<vmem>>, vector<1x1x32xf32>
    %166 = vector.shape_cast %165 : vector<1x1x32xf32> to vector<1x32xf32>
    %c1_82 = arith.constant 1 : index
    %c5_83 = arith.constant 5 : index
    %c0_84 = arith.constant 0 : index
    %167 = vector.load %arg6[%c1_82, %c5_83, %c0_84] : memref<2x8x128xf32, #tpu.memory_space<vmem>>, vector<1x1x32xf32>
    %168 = vector.shape_cast %167 : vector<1x1x32xf32> to vector<1x32xf32>
    %c1_85 = arith.constant 1 : index
    %c0_86 = arith.constant 0 : index
    %c0_87 = arith.constant 0 : index
    %169 = vector.load %arg4[%c1_85, %c0_86, %c0_87] : memref<2x32x128xf32, #tpu.memory_space<vmem>>, vector<1x32x128xf32>
    %170 = vector.shape_cast %169 : vector<1x32x128xf32> to vector<32x128xf32>
    %c1_88 = arith.constant 1 : index
    %c7_89 = arith.constant 7 : index
    %c0_90 = arith.constant 0 : index
    %171 = vector.load %arg6[%c1_88, %c7_89, %c0_90] : memref<2x8x128xf32, #tpu.memory_space<vmem>>, vector<1x1x128xf32>
    %172 = vector.shape_cast %171 : vector<1x1x128xf32> to vector<1x128xf32>
    %c1_91 = arith.constant 1 : index
    %c0_92 = arith.constant 0 : index
    %c0_93 = arith.constant 0 : index
    %173 = vector.load %arg5[%c1_91, %c0_92, %c0_93] : memref<2x128x32xf32, #tpu.memory_space<vmem>>, vector<1x128x32xf32>
    %174 = vector.shape_cast %173 : vector<1x128x32xf32> to vector<128x32xf32>
    %c1_94 = arith.constant 1 : index
    %c6_95 = arith.constant 6 : index
    %c0_96 = arith.constant 0 : index
    %175 = vector.load %arg6[%c1_94, %c6_95, %c0_96] : memref<2x8x128xf32, #tpu.memory_space<vmem>>, vector<1x1x32xf32>
    %176 = vector.shape_cast %175 : vector<1x1x32xf32> to vector<1x32xf32>
    %cst_97 = arith.constant dense<0.000000e+00> : vector<16xf32>
    %177 = vector.multi_reduction <add>, %152, %cst_97 [1] : vector<16x32xf32> to vector<16xf32>
    %178 = vector.shape_cast %177 : vector<16xf32> to vector<16x1xf32>
    %cst_98 = arith.constant 3.200000e+01 : f32
    %179 = vector.broadcast %cst_98 : f32 to vector<16x1xf32>
    %180 = arith.divf %178, %179 : vector<16x1xf32>
    %181 = vector.broadcast %180 : vector<16x1xf32> to vector<16x32xf32>
    %182 = arith.subf %152, %181 : vector<16x32xf32>
    %183 = arith.mulf %182, %182 : vector<16x32xf32>
    %cst_99 = arith.constant dense<0.000000e+00> : vector<16xf32>
    %184 = vector.multi_reduction <add>, %183, %cst_99 [1] : vector<16x32xf32> to vector<16xf32>
    %185 = vector.shape_cast %184 : vector<16xf32> to vector<16x1xf32>
    %cst_100 = arith.constant 3.200000e+01 : f32
    %186 = vector.broadcast %cst_100 : f32 to vector<16x1xf32>
    %187 = arith.divf %185, %186 : vector<16x1xf32>
    %188 = vector.broadcast %180 : vector<16x1xf32> to vector<16x32xf32>
    %189 = arith.subf %152, %188 : vector<16x32xf32>
    %cst_101 = arith.constant 9.99999974E-6 : f32
    %190 = vector.broadcast %cst_101 : f32 to vector<16x1xf32>
    %191 = arith.addf %187, %190 : vector<16x1xf32>
    %192 = math.rsqrt %191 : vector<16x1xf32>
    %193 = vector.broadcast %192 : vector<16x1xf32> to vector<16x32xf32>
    %194 = arith.mulf %189, %193 : vector<16x32xf32>
    %195 = vector.broadcast %154 : vector<1x32xf32> to vector<16x32xf32>
    %196 = arith.mulf %194, %195 : vector<16x32xf32>
    %197 = vector.broadcast %156 : vector<1x32xf32> to vector<16x32xf32>
    %198 = arith.addf %196, %197 : vector<16x32xf32>
    %199 = arith.truncf %12 : vector<2x16xf32> to vector<2x16xbf16>
    %200 = arith.truncf %198 : vector<16x32xf32> to vector<16x32xbf16>
    %cst_102 = arith.constant dense<0.000000e+00> : vector<2x32xf32>
    %201 = tpu.matmul %199, %200, %cst_102 {dimension_numbers = #tpu.dot_dimension_numbers<[1], [0], [0], [1], [0, 0, 1, 1], [], []>} : vector<2x16xbf16>, vector<16x32xbf16>, vector<2x32xf32> -> vector<2x32xf32>
    %202 = arith.truncf %201 : vector<2x32xf32> to vector<2x32xbf16>
    %203 = arith.truncf %158 : vector<32x32xf32> to vector<32x32xbf16>
    %cst_103 = arith.constant dense<0.000000e+00> : vector<2x32xf32>
    %204 = tpu.matmul %202, %203, %cst_103 {dimension_numbers = #tpu.dot_dimension_numbers<[1], [0], [0], [1], [0, 0, 1, 1], [], []>} : vector<2x32xbf16>, vector<32x32xbf16>, vector<2x32xf32> -> vector<2x32xf32>
    %cst_104 = arith.constant 8.000000e+00 : f32
    %205 = vector.broadcast %cst_104 : f32 to vector<1x32xf32>
    %206 = arith.mulf %205, %160 : vector<1x32xf32>
    %207 = vector.broadcast %206 : vector<1x32xf32> to vector<2x32xf32>
    %208 = arith.addf %204, %207 : vector<2x32xf32>
    %209 = arith.truncf %208 : vector<2x32xf32> to vector<2x32xbf16>
    %210 = arith.truncf %162 : vector<32x32xf32> to vector<32x32xbf16>
    %cst_105 = arith.constant dense<0.000000e+00> : vector<2x32xf32>
    %211 = tpu.matmul %209, %210, %cst_105 {dimension_numbers = #tpu.dot_dimension_numbers<[1], [0], [0], [1], [0, 0, 1, 1], [], []>} : vector<2x32xbf16>, vector<32x32xbf16>, vector<2x32xf32> -> vector<2x32xf32>
    %212 = vector.broadcast %164 : vector<1x32xf32> to vector<2x32xf32>
    %213 = arith.addf %211, %212 : vector<2x32xf32>
    %214 = arith.truncf %25 : vector<16x2xf32> to vector<16x2xbf16>
    %215 = arith.truncf %213 : vector<2x32xf32> to vector<2x32xbf16>
    %cst_106 = arith.constant dense<0.000000e+00> : vector<16x32xf32>
    %216 = tpu.matmul %214, %215, %cst_106 {dimension_numbers = #tpu.dot_dimension_numbers<[1], [0], [0], [1], [0, 0, 1, 1], [], []>} : vector<16x2xbf16>, vector<2x32xbf16>, vector<16x32xf32> -> vector<16x32xf32>
    %217 = arith.addf %152, %216 : vector<16x32xf32>
    %cst_107 = arith.constant dense<0.000000e+00> : vector<16xf32>
    %218 = vector.multi_reduction <add>, %217, %cst_107 [1] : vector<16x32xf32> to vector<16xf32>
    %219 = vector.shape_cast %218 : vector<16xf32> to vector<16x1xf32>
    %cst_108 = arith.constant 3.200000e+01 : f32
    %220 = vector.broadcast %cst_108 : f32 to vector<16x1xf32>
    %221 = arith.divf %219, %220 : vector<16x1xf32>
    %222 = vector.broadcast %221 : vector<16x1xf32> to vector<16x32xf32>
    %223 = arith.subf %217, %222 : vector<16x32xf32>
    %224 = arith.mulf %223, %223 : vector<16x32xf32>
    %cst_109 = arith.constant dense<0.000000e+00> : vector<16xf32>
    %225 = vector.multi_reduction <add>, %224, %cst_109 [1] : vector<16x32xf32> to vector<16xf32>
    %226 = vector.shape_cast %225 : vector<16xf32> to vector<16x1xf32>
    %cst_110 = arith.constant 3.200000e+01 : f32
    %227 = vector.broadcast %cst_110 : f32 to vector<16x1xf32>
    %228 = arith.divf %226, %227 : vector<16x1xf32>
    %229 = vector.broadcast %221 : vector<16x1xf32> to vector<16x32xf32>
    %230 = arith.subf %217, %229 : vector<16x32xf32>
    %cst_111 = arith.constant 9.99999974E-6 : f32
    %231 = vector.broadcast %cst_111 : f32 to vector<16x1xf32>
    %232 = arith.addf %228, %231 : vector<16x1xf32>
    %233 = math.rsqrt %232 : vector<16x1xf32>
    %234 = vector.broadcast %233 : vector<16x1xf32> to vector<16x32xf32>
    %235 = arith.mulf %230, %234 : vector<16x32xf32>
    %236 = vector.broadcast %166 : vector<1x32xf32> to vector<16x32xf32>
    %237 = arith.mulf %235, %236 : vector<16x32xf32>
    %238 = vector.broadcast %168 : vector<1x32xf32> to vector<16x32xf32>
    %239 = arith.addf %237, %238 : vector<16x32xf32>
    %240 = arith.truncf %239 : vector<16x32xf32> to vector<16x32xbf16>
    %241 = arith.truncf %170 : vector<32x128xf32> to vector<32x128xbf16>
    %cst_112 = arith.constant dense<0.000000e+00> : vector<16x128xf32>
    %242 = tpu.matmul %240, %241, %cst_112 {dimension_numbers = #tpu.dot_dimension_numbers<[1], [0], [0], [1], [0, 0, 1, 1], [], []>} : vector<16x32xbf16>, vector<32x128xbf16>, vector<16x128xf32> -> vector<16x128xf32>
    %243 = vector.broadcast %172 : vector<1x128xf32> to vector<16x128xf32>
    %244 = arith.addf %242, %243 : vector<16x128xf32>
    %cst_113 = arith.constant 0.000000e+00 : f32
    %245 = vector.broadcast %cst_113 : f32 to vector<16x128xf32>
    %246 = arith.maximumf %244, %245 : vector<16x128xf32>
    %247 = arith.truncf %246 : vector<16x128xf32> to vector<16x128xbf16>
    %248 = arith.truncf %174 : vector<128x32xf32> to vector<128x32xbf16>
    %cst_114 = arith.constant dense<0.000000e+00> : vector<16x32xf32>
    %249 = tpu.matmul %247, %248, %cst_114 {dimension_numbers = #tpu.dot_dimension_numbers<[1], [0], [0], [1], [0, 0, 1, 1], [], []>} : vector<16x128xbf16>, vector<128x32xbf16>, vector<16x32xf32> -> vector<16x32xf32>
    %250 = arith.addf %217, %249 : vector<16x32xf32>
    %251 = vector.broadcast %176 : vector<1x32xf32> to vector<16x32xf32>
    %252 = arith.addf %250, %251 : vector<16x32xf32>
    %c0_115 = arith.constant 0 : index
    %c0_116 = arith.constant 0 : index
    %253 = vector.load %arg2[%c0_115, %c0_116] : memref<16x32xf32, #tpu.memory_space<vmem>>, vector<16x32xf32>
    %c0_117 = arith.constant 0 : index
    %c0_118 = arith.constant 0 : index
    %c0_119 = arith.constant 0 : index
    %254 = vector.load %arg10[%c0_117, %c0_118, %c0_119] : memref<2x12x128xf32, #tpu.memory_space<vmem>>, vector<1x1x32xf32>
    %255 = vector.shape_cast %254 : vector<1x1x32xf32> to vector<1x32xf32>
    %c0_120 = arith.constant 0 : index
    %c1_121 = arith.constant 1 : index
    %c0_122 = arith.constant 0 : index
    %256 = vector.load %arg10[%c0_120, %c1_121, %c0_122] : memref<2x12x128xf32, #tpu.memory_space<vmem>>, vector<1x1x32xf32>
    %257 = vector.shape_cast %256 : vector<1x1x32xf32> to vector<1x32xf32>
    %c0_123 = arith.constant 0 : index
    %c0_124 = arith.constant 0 : index
    %c0_125 = arith.constant 0 : index
    %c0_126 = arith.constant 0 : index
    %258 = vector.load %arg7[%c0_123, %c0_124, %c0_125, %c0_126] : memref<2x4x32x32xf32, #tpu.memory_space<vmem>>, vector<1x1x32x32xf32>
    %259 = vector.shape_cast %258 : vector<1x1x32x32xf32> to vector<32x32xf32>
    %c0_127 = arith.constant 0 : index
    %c2_128 = arith.constant 2 : index
    %c0_129 = arith.constant 0 : index
    %260 = vector.load %arg10[%c0_127, %c2_128, %c0_129] : memref<2x12x128xf32, #tpu.memory_space<vmem>>, vector<1x1x32xf32>
    %261 = vector.shape_cast %260 : vector<1x1x32xf32> to vector<1x32xf32>
    %c0_130 = arith.constant 0 : index
    %c1_131 = arith.constant 1 : index
    %c0_132 = arith.constant 0 : index
    %c0_133 = arith.constant 0 : index
    %262 = vector.load %arg7[%c0_130, %c1_131, %c0_132, %c0_133] : memref<2x4x32x32xf32, #tpu.memory_space<vmem>>, vector<1x1x32x32xf32>
    %263 = vector.shape_cast %262 : vector<1x1x32x32xf32> to vector<32x32xf32>
    %c0_134 = arith.constant 0 : index
    %c3_135 = arith.constant 3 : index
    %c0_136 = arith.constant 0 : index
    %264 = vector.load %arg10[%c0_134, %c3_135, %c0_136] : memref<2x12x128xf32, #tpu.memory_space<vmem>>, vector<1x1x32xf32>
    %265 = vector.shape_cast %264 : vector<1x1x32xf32> to vector<1x32xf32>
    %cst_137 = arith.constant dense<0.000000e+00> : vector<16xf32>
    %266 = vector.multi_reduction <add>, %253, %cst_137 [1] : vector<16x32xf32> to vector<16xf32>
    %267 = vector.shape_cast %266 : vector<16xf32> to vector<16x1xf32>
    %cst_138 = arith.constant 3.200000e+01 : f32
    %268 = vector.broadcast %cst_138 : f32 to vector<16x1xf32>
    %269 = arith.divf %267, %268 : vector<16x1xf32>
    %270 = vector.broadcast %269 : vector<16x1xf32> to vector<16x32xf32>
    %271 = arith.subf %253, %270 : vector<16x32xf32>
    %272 = arith.mulf %271, %271 : vector<16x32xf32>
    %cst_139 = arith.constant dense<0.000000e+00> : vector<16xf32>
    %273 = vector.multi_reduction <add>, %272, %cst_139 [1] : vector<16x32xf32> to vector<16xf32>
    %274 = vector.shape_cast %273 : vector<16xf32> to vector<16x1xf32>
    %cst_140 = arith.constant 3.200000e+01 : f32
    %275 = vector.broadcast %cst_140 : f32 to vector<16x1xf32>
    %276 = arith.divf %274, %275 : vector<16x1xf32>
    %277 = vector.broadcast %269 : vector<16x1xf32> to vector<16x32xf32>
    %278 = arith.subf %253, %277 : vector<16x32xf32>
    %cst_141 = arith.constant 9.99999974E-6 : f32
    %279 = vector.broadcast %cst_141 : f32 to vector<16x1xf32>
    %280 = arith.addf %276, %279 : vector<16x1xf32>
    %281 = math.rsqrt %280 : vector<16x1xf32>
    %282 = vector.broadcast %281 : vector<16x1xf32> to vector<16x32xf32>
    %283 = arith.mulf %278, %282 : vector<16x32xf32>
    %284 = vector.broadcast %255 : vector<1x32xf32> to vector<16x32xf32>
    %285 = arith.mulf %283, %284 : vector<16x32xf32>
    %286 = vector.broadcast %257 : vector<1x32xf32> to vector<16x32xf32>
    %287 = arith.addf %285, %286 : vector<16x32xf32>
    %288 = arith.truncf %38 : vector<2x16xf32> to vector<2x16xbf16>
    %289 = arith.truncf %287 : vector<16x32xf32> to vector<16x32xbf16>
    %cst_142 = arith.constant dense<0.000000e+00> : vector<2x32xf32>
    %290 = tpu.matmul %288, %289, %cst_142 {dimension_numbers = #tpu.dot_dimension_numbers<[1], [0], [0], [1], [0, 0, 1, 1], [], []>} : vector<2x16xbf16>, vector<16x32xbf16>, vector<2x32xf32> -> vector<2x32xf32>
    %291 = arith.truncf %290 : vector<2x32xf32> to vector<2x32xbf16>
    %292 = arith.truncf %259 : vector<32x32xf32> to vector<32x32xbf16>
    %cst_143 = arith.constant dense<0.000000e+00> : vector<2x32xf32>
    %293 = tpu.matmul %291, %292, %cst_143 {dimension_numbers = #tpu.dot_dimension_numbers<[1], [0], [0], [1], [0, 0, 1, 1], [], []>} : vector<2x32xbf16>, vector<32x32xbf16>, vector<2x32xf32> -> vector<2x32xf32>
    %cst_144 = arith.constant 8.000000e+00 : f32
    %294 = vector.broadcast %cst_144 : f32 to vector<1x32xf32>
    %295 = arith.mulf %294, %261 : vector<1x32xf32>
    %296 = vector.broadcast %295 : vector<1x32xf32> to vector<2x32xf32>
    %297 = arith.addf %293, %296 : vector<2x32xf32>
    %298 = arith.truncf %297 : vector<2x32xf32> to vector<2x32xbf16>
    %299 = arith.truncf %263 : vector<32x32xf32> to vector<32x32xbf16>
    %cst_145 = arith.constant dense<0.000000e+00> : vector<2x32xf32>
    %300 = tpu.matmul %298, %299, %cst_145 {dimension_numbers = #tpu.dot_dimension_numbers<[1], [0], [0], [1], [0, 0, 1, 1], [], []>} : vector<2x32xbf16>, vector<32x32xbf16>, vector<2x32xf32> -> vector<2x32xf32>
    %301 = vector.broadcast %265 : vector<1x32xf32> to vector<2x32xf32>
    %302 = arith.addf %300, %301 : vector<2x32xf32>
    %303 = arith.truncf %51 : vector<16x2xf32> to vector<16x2xbf16>
    %304 = arith.truncf %302 : vector<2x32xf32> to vector<2x32xbf16>
    %cst_146 = arith.constant dense<0.000000e+00> : vector<16x32xf32>
    %305 = tpu.matmul %303, %304, %cst_146 {dimension_numbers = #tpu.dot_dimension_numbers<[1], [0], [0], [1], [0, 0, 1, 1], [], []>} : vector<16x2xbf16>, vector<2x32xbf16>, vector<16x32xf32> -> vector<16x32xf32>
    %306 = arith.addf %253, %305 : vector<16x32xf32>
    %c0_147 = arith.constant 0 : index
    %c4_148 = arith.constant 4 : index
    %c0_149 = arith.constant 0 : index
    %307 = vector.load %arg10[%c0_147, %c4_148, %c0_149] : memref<2x12x128xf32, #tpu.memory_space<vmem>>, vector<1x1x32xf32>
    %308 = vector.shape_cast %307 : vector<1x1x32xf32> to vector<1x32xf32>
    %c0_150 = arith.constant 0 : index
    %c5_151 = arith.constant 5 : index
    %c0_152 = arith.constant 0 : index
    %309 = vector.load %arg10[%c0_150, %c5_151, %c0_152] : memref<2x12x128xf32, #tpu.memory_space<vmem>>, vector<1x1x32xf32>
    %310 = vector.shape_cast %309 : vector<1x1x32xf32> to vector<1x32xf32>
    %c0_153 = arith.constant 0 : index
    %c2_154 = arith.constant 2 : index
    %c0_155 = arith.constant 0 : index
    %c0_156 = arith.constant 0 : index
    %311 = vector.load %arg7[%c0_153, %c2_154, %c0_155, %c0_156] : memref<2x4x32x32xf32, #tpu.memory_space<vmem>>, vector<1x1x32x32xf32>
    %312 = vector.shape_cast %311 : vector<1x1x32x32xf32> to vector<32x32xf32>
    %c0_157 = arith.constant 0 : index
    %c6_158 = arith.constant 6 : index
    %c0_159 = arith.constant 0 : index
    %313 = vector.load %arg10[%c0_157, %c6_158, %c0_159] : memref<2x12x128xf32, #tpu.memory_space<vmem>>, vector<1x1x32xf32>
    %314 = vector.shape_cast %313 : vector<1x1x32xf32> to vector<1x32xf32>
    %c0_160 = arith.constant 0 : index
    %c3_161 = arith.constant 3 : index
    %c0_162 = arith.constant 0 : index
    %c0_163 = arith.constant 0 : index
    %315 = vector.load %arg7[%c0_160, %c3_161, %c0_162, %c0_163] : memref<2x4x32x32xf32, #tpu.memory_space<vmem>>, vector<1x1x32x32xf32>
    %316 = vector.shape_cast %315 : vector<1x1x32x32xf32> to vector<32x32xf32>
    %c0_164 = arith.constant 0 : index
    %c7_165 = arith.constant 7 : index
    %c0_166 = arith.constant 0 : index
    %317 = vector.load %arg10[%c0_164, %c7_165, %c0_166] : memref<2x12x128xf32, #tpu.memory_space<vmem>>, vector<1x1x32xf32>
    %318 = vector.shape_cast %317 : vector<1x1x32xf32> to vector<1x32xf32>
    %c0_167 = arith.constant 0 : index
    %c8 = arith.constant 8 : index
    %c0_168 = arith.constant 0 : index
    %319 = vector.load %arg10[%c0_167, %c8, %c0_168] : memref<2x12x128xf32, #tpu.memory_space<vmem>>, vector<1x1x32xf32>
    %320 = vector.shape_cast %319 : vector<1x1x32xf32> to vector<1x32xf32>
    %c0_169 = arith.constant 0 : index
    %c9 = arith.constant 9 : index
    %c0_170 = arith.constant 0 : index
    %321 = vector.load %arg10[%c0_169, %c9, %c0_170] : memref<2x12x128xf32, #tpu.memory_space<vmem>>, vector<1x1x32xf32>
    %322 = vector.shape_cast %321 : vector<1x1x32xf32> to vector<1x32xf32>
    %c0_171 = arith.constant 0 : index
    %c0_172 = arith.constant 0 : index
    %c0_173 = arith.constant 0 : index
    %323 = vector.load %arg8[%c0_171, %c0_172, %c0_173] : memref<2x32x128xf32, #tpu.memory_space<vmem>>, vector<1x32x128xf32>
    %324 = vector.shape_cast %323 : vector<1x32x128xf32> to vector<32x128xf32>
    %c0_174 = arith.constant 0 : index
    %c11 = arith.constant 11 : index
    %c0_175 = arith.constant 0 : index
    %325 = vector.load %arg10[%c0_174, %c11, %c0_175] : memref<2x12x128xf32, #tpu.memory_space<vmem>>, vector<1x1x128xf32>
    %326 = vector.shape_cast %325 : vector<1x1x128xf32> to vector<1x128xf32>
    %c0_176 = arith.constant 0 : index
    %c0_177 = arith.constant 0 : index
    %c0_178 = arith.constant 0 : index
    %327 = vector.load %arg9[%c0_176, %c0_177, %c0_178] : memref<2x128x32xf32, #tpu.memory_space<vmem>>, vector<1x128x32xf32>
    %328 = vector.shape_cast %327 : vector<1x128x32xf32> to vector<128x32xf32>
    %c0_179 = arith.constant 0 : index
    %c10 = arith.constant 10 : index
    %c0_180 = arith.constant 0 : index
    %329 = vector.load %arg10[%c0_179, %c10, %c0_180] : memref<2x12x128xf32, #tpu.memory_space<vmem>>, vector<1x1x32xf32>
    %330 = vector.shape_cast %329 : vector<1x1x32xf32> to vector<1x32xf32>
    %cst_181 = arith.constant dense<0.000000e+00> : vector<16xf32>
    %331 = vector.multi_reduction <add>, %252, %cst_181 [1] : vector<16x32xf32> to vector<16xf32>
    %332 = vector.shape_cast %331 : vector<16xf32> to vector<16x1xf32>
    %cst_182 = arith.constant 3.200000e+01 : f32
    %333 = vector.broadcast %cst_182 : f32 to vector<16x1xf32>
    %334 = arith.divf %332, %333 : vector<16x1xf32>
    %335 = vector.broadcast %334 : vector<16x1xf32> to vector<16x32xf32>
    %336 = arith.subf %252, %335 : vector<16x32xf32>
    %337 = arith.mulf %336, %336 : vector<16x32xf32>
    %cst_183 = arith.constant dense<0.000000e+00> : vector<16xf32>
    %338 = vector.multi_reduction <add>, %337, %cst_183 [1] : vector<16x32xf32> to vector<16xf32>
    %339 = vector.shape_cast %338 : vector<16xf32> to vector<16x1xf32>
    %cst_184 = arith.constant 3.200000e+01 : f32
    %340 = vector.broadcast %cst_184 : f32 to vector<16x1xf32>
    %341 = arith.divf %339, %340 : vector<16x1xf32>
    %342 = vector.broadcast %334 : vector<16x1xf32> to vector<16x32xf32>
    %343 = arith.subf %252, %342 : vector<16x32xf32>
    %cst_185 = arith.constant 9.99999974E-6 : f32
    %344 = vector.broadcast %cst_185 : f32 to vector<16x1xf32>
    %345 = arith.addf %341, %344 : vector<16x1xf32>
    %346 = math.rsqrt %345 : vector<16x1xf32>
    %347 = vector.broadcast %346 : vector<16x1xf32> to vector<16x32xf32>
    %348 = arith.mulf %343, %347 : vector<16x32xf32>
    %349 = vector.broadcast %308 : vector<1x32xf32> to vector<16x32xf32>
    %350 = arith.mulf %348, %349 : vector<16x32xf32>
    %351 = vector.broadcast %310 : vector<1x32xf32> to vector<16x32xf32>
    %352 = arith.addf %350, %351 : vector<16x32xf32>
    %353 = arith.truncf %12 : vector<2x16xf32> to vector<2x16xbf16>
    %354 = arith.truncf %352 : vector<16x32xf32> to vector<16x32xbf16>
    %cst_186 = arith.constant dense<0.000000e+00> : vector<2x32xf32>
    %355 = tpu.matmul %353, %354, %cst_186 {dimension_numbers = #tpu.dot_dimension_numbers<[1], [0], [0], [1], [0, 0, 1, 1], [], []>} : vector<2x16xbf16>, vector<16x32xbf16>, vector<2x32xf32> -> vector<2x32xf32>
    %356 = arith.truncf %355 : vector<2x32xf32> to vector<2x32xbf16>
    %357 = arith.truncf %312 : vector<32x32xf32> to vector<32x32xbf16>
    %cst_187 = arith.constant dense<0.000000e+00> : vector<2x32xf32>
    %358 = tpu.matmul %356, %357, %cst_187 {dimension_numbers = #tpu.dot_dimension_numbers<[1], [0], [0], [1], [0, 0, 1, 1], [], []>} : vector<2x32xbf16>, vector<32x32xbf16>, vector<2x32xf32> -> vector<2x32xf32>
    %cst_188 = arith.constant 8.000000e+00 : f32
    %359 = vector.broadcast %cst_188 : f32 to vector<1x32xf32>
    %360 = arith.mulf %359, %314 : vector<1x32xf32>
    %361 = vector.broadcast %360 : vector<1x32xf32> to vector<2x32xf32>
    %362 = arith.addf %358, %361 : vector<2x32xf32>
    %363 = arith.truncf %362 : vector<2x32xf32> to vector<2x32xbf16>
    %364 = arith.truncf %316 : vector<32x32xf32> to vector<32x32xbf16>
    %cst_189 = arith.constant dense<0.000000e+00> : vector<2x32xf32>
    %365 = tpu.matmul %363, %364, %cst_189 {dimension_numbers = #tpu.dot_dimension_numbers<[1], [0], [0], [1], [0, 0, 1, 1], [], []>} : vector<2x32xbf16>, vector<32x32xbf16>, vector<2x32xf32> -> vector<2x32xf32>
    %366 = vector.broadcast %318 : vector<1x32xf32> to vector<2x32xf32>
    %367 = arith.addf %365, %366 : vector<2x32xf32>
    %368 = arith.truncf %51 : vector<16x2xf32> to vector<16x2xbf16>
    %369 = arith.truncf %367 : vector<2x32xf32> to vector<2x32xbf16>
    %cst_190 = arith.constant dense<0.000000e+00> : vector<16x32xf32>
    %370 = tpu.matmul %368, %369, %cst_190 {dimension_numbers = #tpu.dot_dimension_numbers<[1], [0], [0], [1], [0, 0, 1, 1], [], []>} : vector<16x2xbf16>, vector<2x32xbf16>, vector<16x32xf32> -> vector<16x32xf32>
    %371 = arith.addf %306, %370 : vector<16x32xf32>
    %cst_191 = arith.constant dense<0.000000e+00> : vector<16xf32>
    %372 = vector.multi_reduction <add>, %371, %cst_191 [1] : vector<16x32xf32> to vector<16xf32>
    %373 = vector.shape_cast %372 : vector<16xf32> to vector<16x1xf32>
    %cst_192 = arith.constant 3.200000e+01 : f32
    %374 = vector.broadcast %cst_192 : f32 to vector<16x1xf32>
    %375 = arith.divf %373, %374 : vector<16x1xf32>
    %376 = vector.broadcast %375 : vector<16x1xf32> to vector<16x32xf32>
    %377 = arith.subf %371, %376 : vector<16x32xf32>
    %378 = arith.mulf %377, %377 : vector<16x32xf32>
    %cst_193 = arith.constant dense<0.000000e+00> : vector<16xf32>
    %379 = vector.multi_reduction <add>, %378, %cst_193 [1] : vector<16x32xf32> to vector<16xf32>
    %380 = vector.shape_cast %379 : vector<16xf32> to vector<16x1xf32>
    %cst_194 = arith.constant 3.200000e+01 : f32
    %381 = vector.broadcast %cst_194 : f32 to vector<16x1xf32>
    %382 = arith.divf %380, %381 : vector<16x1xf32>
    %383 = vector.broadcast %375 : vector<16x1xf32> to vector<16x32xf32>
    %384 = arith.subf %371, %383 : vector<16x32xf32>
    %cst_195 = arith.constant 9.99999974E-6 : f32
    %385 = vector.broadcast %cst_195 : f32 to vector<16x1xf32>
    %386 = arith.addf %382, %385 : vector<16x1xf32>
    %387 = math.rsqrt %386 : vector<16x1xf32>
    %388 = vector.broadcast %387 : vector<16x1xf32> to vector<16x32xf32>
    %389 = arith.mulf %384, %388 : vector<16x32xf32>
    %390 = vector.broadcast %320 : vector<1x32xf32> to vector<16x32xf32>
    %391 = arith.mulf %389, %390 : vector<16x32xf32>
    %392 = vector.broadcast %322 : vector<1x32xf32> to vector<16x32xf32>
    %393 = arith.addf %391, %392 : vector<16x32xf32>
    %394 = arith.truncf %393 : vector<16x32xf32> to vector<16x32xbf16>
    %395 = arith.truncf %324 : vector<32x128xf32> to vector<32x128xbf16>
    %cst_196 = arith.constant dense<0.000000e+00> : vector<16x128xf32>
    %396 = tpu.matmul %394, %395, %cst_196 {dimension_numbers = #tpu.dot_dimension_numbers<[1], [0], [0], [1], [0, 0, 1, 1], [], []>} : vector<16x32xbf16>, vector<32x128xbf16>, vector<16x128xf32> -> vector<16x128xf32>
    %397 = vector.broadcast %326 : vector<1x128xf32> to vector<16x128xf32>
    %398 = arith.addf %396, %397 : vector<16x128xf32>
    %cst_197 = arith.constant 0.000000e+00 : f32
    %399 = vector.broadcast %cst_197 : f32 to vector<16x128xf32>
    %400 = arith.maximumf %398, %399 : vector<16x128xf32>
    %401 = arith.truncf %400 : vector<16x128xf32> to vector<16x128xbf16>
    %402 = arith.truncf %328 : vector<128x32xf32> to vector<128x32xbf16>
    %cst_198 = arith.constant dense<0.000000e+00> : vector<16x32xf32>
    %403 = tpu.matmul %401, %402, %cst_198 {dimension_numbers = #tpu.dot_dimension_numbers<[1], [0], [0], [1], [0, 0, 1, 1], [], []>} : vector<16x128xbf16>, vector<128x32xbf16>, vector<16x32xf32> -> vector<16x32xf32>
    %404 = arith.addf %371, %403 : vector<16x32xf32>
    %405 = vector.broadcast %330 : vector<1x32xf32> to vector<16x32xf32>
    %406 = arith.addf %404, %405 : vector<16x32xf32>
    %c1_199 = arith.constant 1 : index
    %c0_200 = arith.constant 0 : index
    %c0_201 = arith.constant 0 : index
    %407 = vector.load %arg10[%c1_199, %c0_200, %c0_201] : memref<2x12x128xf32, #tpu.memory_space<vmem>>, vector<1x1x32xf32>
    %408 = vector.shape_cast %407 : vector<1x1x32xf32> to vector<1x32xf32>
    %c1_202 = arith.constant 1 : index
    %c1_203 = arith.constant 1 : index
    %c0_204 = arith.constant 0 : index
    %409 = vector.load %arg10[%c1_202, %c1_203, %c0_204] : memref<2x12x128xf32, #tpu.memory_space<vmem>>, vector<1x1x32xf32>
    %410 = vector.shape_cast %409 : vector<1x1x32xf32> to vector<1x32xf32>
    %c1_205 = arith.constant 1 : index
    %c0_206 = arith.constant 0 : index
    %c0_207 = arith.constant 0 : index
    %c0_208 = arith.constant 0 : index
    %411 = vector.load %arg7[%c1_205, %c0_206, %c0_207, %c0_208] : memref<2x4x32x32xf32, #tpu.memory_space<vmem>>, vector<1x1x32x32xf32>
    %412 = vector.shape_cast %411 : vector<1x1x32x32xf32> to vector<32x32xf32>
    %c1_209 = arith.constant 1 : index
    %c2_210 = arith.constant 2 : index
    %c0_211 = arith.constant 0 : index
    %413 = vector.load %arg10[%c1_209, %c2_210, %c0_211] : memref<2x12x128xf32, #tpu.memory_space<vmem>>, vector<1x1x32xf32>
    %414 = vector.shape_cast %413 : vector<1x1x32xf32> to vector<1x32xf32>
    %c1_212 = arith.constant 1 : index
    %c1_213 = arith.constant 1 : index
    %c0_214 = arith.constant 0 : index
    %c0_215 = arith.constant 0 : index
    %415 = vector.load %arg7[%c1_212, %c1_213, %c0_214, %c0_215] : memref<2x4x32x32xf32, #tpu.memory_space<vmem>>, vector<1x1x32x32xf32>
    %416 = vector.shape_cast %415 : vector<1x1x32x32xf32> to vector<32x32xf32>
    %c1_216 = arith.constant 1 : index
    %c3_217 = arith.constant 3 : index
    %c0_218 = arith.constant 0 : index
    %417 = vector.load %arg10[%c1_216, %c3_217, %c0_218] : memref<2x12x128xf32, #tpu.memory_space<vmem>>, vector<1x1x32xf32>
    %418 = vector.shape_cast %417 : vector<1x1x32xf32> to vector<1x32xf32>
    %cst_219 = arith.constant dense<0.000000e+00> : vector<16xf32>
    %419 = vector.multi_reduction <add>, %406, %cst_219 [1] : vector<16x32xf32> to vector<16xf32>
    %420 = vector.shape_cast %419 : vector<16xf32> to vector<16x1xf32>
    %cst_220 = arith.constant 3.200000e+01 : f32
    %421 = vector.broadcast %cst_220 : f32 to vector<16x1xf32>
    %422 = arith.divf %420, %421 : vector<16x1xf32>
    %423 = vector.broadcast %422 : vector<16x1xf32> to vector<16x32xf32>
    %424 = arith.subf %406, %423 : vector<16x32xf32>
    %425 = arith.mulf %424, %424 : vector<16x32xf32>
    %cst_221 = arith.constant dense<0.000000e+00> : vector<16xf32>
    %426 = vector.multi_reduction <add>, %425, %cst_221 [1] : vector<16x32xf32> to vector<16xf32>
    %427 = vector.shape_cast %426 : vector<16xf32> to vector<16x1xf32>
    %cst_222 = arith.constant 3.200000e+01 : f32
    %428 = vector.broadcast %cst_222 : f32 to vector<16x1xf32>
    %429 = arith.divf %427, %428 : vector<16x1xf32>
    %430 = vector.broadcast %422 : vector<16x1xf32> to vector<16x32xf32>
    %431 = arith.subf %406, %430 : vector<16x32xf32>
    %cst_223 = arith.constant 9.99999974E-6 : f32
    %432 = vector.broadcast %cst_223 : f32 to vector<16x1xf32>
    %433 = arith.addf %429, %432 : vector<16x1xf32>
    %434 = math.rsqrt %433 : vector<16x1xf32>
    %435 = vector.broadcast %434 : vector<16x1xf32> to vector<16x32xf32>
    %436 = arith.mulf %431, %435 : vector<16x32xf32>
    %437 = vector.broadcast %408 : vector<1x32xf32> to vector<16x32xf32>
    %438 = arith.mulf %436, %437 : vector<16x32xf32>
    %439 = vector.broadcast %410 : vector<1x32xf32> to vector<16x32xf32>
    %440 = arith.addf %438, %439 : vector<16x32xf32>
    %441 = arith.truncf %38 : vector<2x16xf32> to vector<2x16xbf16>
    %442 = arith.truncf %440 : vector<16x32xf32> to vector<16x32xbf16>
    %cst_224 = arith.constant dense<0.000000e+00> : vector<2x32xf32>
    %443 = tpu.matmul %441, %442, %cst_224 {dimension_numbers = #tpu.dot_dimension_numbers<[1], [0], [0], [1], [0, 0, 1, 1], [], []>} : vector<2x16xbf16>, vector<16x32xbf16>, vector<2x32xf32> -> vector<2x32xf32>
    %444 = arith.truncf %443 : vector<2x32xf32> to vector<2x32xbf16>
    %445 = arith.truncf %412 : vector<32x32xf32> to vector<32x32xbf16>
    %cst_225 = arith.constant dense<0.000000e+00> : vector<2x32xf32>
    %446 = tpu.matmul %444, %445, %cst_225 {dimension_numbers = #tpu.dot_dimension_numbers<[1], [0], [0], [1], [0, 0, 1, 1], [], []>} : vector<2x32xbf16>, vector<32x32xbf16>, vector<2x32xf32> -> vector<2x32xf32>
    %cst_226 = arith.constant 8.000000e+00 : f32
    %447 = vector.broadcast %cst_226 : f32 to vector<1x32xf32>
    %448 = arith.mulf %447, %414 : vector<1x32xf32>
    %449 = vector.broadcast %448 : vector<1x32xf32> to vector<2x32xf32>
    %450 = arith.addf %446, %449 : vector<2x32xf32>
    %451 = arith.truncf %450 : vector<2x32xf32> to vector<2x32xbf16>
    %452 = arith.truncf %416 : vector<32x32xf32> to vector<32x32xbf16>
    %cst_227 = arith.constant dense<0.000000e+00> : vector<2x32xf32>
    %453 = tpu.matmul %451, %452, %cst_227 {dimension_numbers = #tpu.dot_dimension_numbers<[1], [0], [0], [1], [0, 0, 1, 1], [], []>} : vector<2x32xbf16>, vector<32x32xbf16>, vector<2x32xf32> -> vector<2x32xf32>
    %454 = vector.broadcast %418 : vector<1x32xf32> to vector<2x32xf32>
    %455 = arith.addf %453, %454 : vector<2x32xf32>
    %456 = arith.truncf %51 : vector<16x2xf32> to vector<16x2xbf16>
    %457 = arith.truncf %455 : vector<2x32xf32> to vector<2x32xbf16>
    %cst_228 = arith.constant dense<0.000000e+00> : vector<16x32xf32>
    %458 = tpu.matmul %456, %457, %cst_228 {dimension_numbers = #tpu.dot_dimension_numbers<[1], [0], [0], [1], [0, 0, 1, 1], [], []>} : vector<16x2xbf16>, vector<2x32xbf16>, vector<16x32xf32> -> vector<16x32xf32>
    %459 = arith.addf %406, %458 : vector<16x32xf32>
    %c1_229 = arith.constant 1 : index
    %c4_230 = arith.constant 4 : index
    %c0_231 = arith.constant 0 : index
    %460 = vector.load %arg10[%c1_229, %c4_230, %c0_231] : memref<2x12x128xf32, #tpu.memory_space<vmem>>, vector<1x1x32xf32>
    %461 = vector.shape_cast %460 : vector<1x1x32xf32> to vector<1x32xf32>
    %c1_232 = arith.constant 1 : index
    %c5_233 = arith.constant 5 : index
    %c0_234 = arith.constant 0 : index
    %462 = vector.load %arg10[%c1_232, %c5_233, %c0_234] : memref<2x12x128xf32, #tpu.memory_space<vmem>>, vector<1x1x32xf32>
    %463 = vector.shape_cast %462 : vector<1x1x32xf32> to vector<1x32xf32>
    %c1_235 = arith.constant 1 : index
    %c2_236 = arith.constant 2 : index
    %c0_237 = arith.constant 0 : index
    %c0_238 = arith.constant 0 : index
    %464 = vector.load %arg7[%c1_235, %c2_236, %c0_237, %c0_238] : memref<2x4x32x32xf32, #tpu.memory_space<vmem>>, vector<1x1x32x32xf32>
    %465 = vector.shape_cast %464 : vector<1x1x32x32xf32> to vector<32x32xf32>
    %c1_239 = arith.constant 1 : index
    %c6_240 = arith.constant 6 : index
    %c0_241 = arith.constant 0 : index
    %466 = vector.load %arg10[%c1_239, %c6_240, %c0_241] : memref<2x12x128xf32, #tpu.memory_space<vmem>>, vector<1x1x32xf32>
    %467 = vector.shape_cast %466 : vector<1x1x32xf32> to vector<1x32xf32>
    %c1_242 = arith.constant 1 : index
    %c3_243 = arith.constant 3 : index
    %c0_244 = arith.constant 0 : index
    %c0_245 = arith.constant 0 : index
    %468 = vector.load %arg7[%c1_242, %c3_243, %c0_244, %c0_245] : memref<2x4x32x32xf32, #tpu.memory_space<vmem>>, vector<1x1x32x32xf32>
    %469 = vector.shape_cast %468 : vector<1x1x32x32xf32> to vector<32x32xf32>
    %c1_246 = arith.constant 1 : index
    %c7_247 = arith.constant 7 : index
    %c0_248 = arith.constant 0 : index
    %470 = vector.load %arg10[%c1_246, %c7_247, %c0_248] : memref<2x12x128xf32, #tpu.memory_space<vmem>>, vector<1x1x32xf32>
    %471 = vector.shape_cast %470 : vector<1x1x32xf32> to vector<1x32xf32>
    %c1_249 = arith.constant 1 : index
    %c8_250 = arith.constant 8 : index
    %c0_251 = arith.constant 0 : index
    %472 = vector.load %arg10[%c1_249, %c8_250, %c0_251] : memref<2x12x128xf32, #tpu.memory_space<vmem>>, vector<1x1x32xf32>
    %473 = vector.shape_cast %472 : vector<1x1x32xf32> to vector<1x32xf32>
    %c1_252 = arith.constant 1 : index
    %c9_253 = arith.constant 9 : index
    %c0_254 = arith.constant 0 : index
    %474 = vector.load %arg10[%c1_252, %c9_253, %c0_254] : memref<2x12x128xf32, #tpu.memory_space<vmem>>, vector<1x1x32xf32>
    %475 = vector.shape_cast %474 : vector<1x1x32xf32> to vector<1x32xf32>
    %c1_255 = arith.constant 1 : index
    %c0_256 = arith.constant 0 : index
    %c0_257 = arith.constant 0 : index
    %476 = vector.load %arg8[%c1_255, %c0_256, %c0_257] : memref<2x32x128xf32, #tpu.memory_space<vmem>>, vector<1x32x128xf32>
    %477 = vector.shape_cast %476 : vector<1x32x128xf32> to vector<32x128xf32>
    %c1_258 = arith.constant 1 : index
    %c11_259 = arith.constant 11 : index
    %c0_260 = arith.constant 0 : index
    %478 = vector.load %arg10[%c1_258, %c11_259, %c0_260] : memref<2x12x128xf32, #tpu.memory_space<vmem>>, vector<1x1x128xf32>
    %479 = vector.shape_cast %478 : vector<1x1x128xf32> to vector<1x128xf32>
    %c1_261 = arith.constant 1 : index
    %c0_262 = arith.constant 0 : index
    %c0_263 = arith.constant 0 : index
    %480 = vector.load %arg9[%c1_261, %c0_262, %c0_263] : memref<2x128x32xf32, #tpu.memory_space<vmem>>, vector<1x128x32xf32>
    %481 = vector.shape_cast %480 : vector<1x128x32xf32> to vector<128x32xf32>
    %c1_264 = arith.constant 1 : index
    %c10_265 = arith.constant 10 : index
    %c0_266 = arith.constant 0 : index
    %482 = vector.load %arg10[%c1_264, %c10_265, %c0_266] : memref<2x12x128xf32, #tpu.memory_space<vmem>>, vector<1x1x32xf32>
    %483 = vector.shape_cast %482 : vector<1x1x32xf32> to vector<1x32xf32>
    %cst_267 = arith.constant dense<0.000000e+00> : vector<16xf32>
    %484 = vector.multi_reduction <add>, %252, %cst_267 [1] : vector<16x32xf32> to vector<16xf32>
    %485 = vector.shape_cast %484 : vector<16xf32> to vector<16x1xf32>
    %cst_268 = arith.constant 3.200000e+01 : f32
    %486 = vector.broadcast %cst_268 : f32 to vector<16x1xf32>
    %487 = arith.divf %485, %486 : vector<16x1xf32>
    %488 = vector.broadcast %487 : vector<16x1xf32> to vector<16x32xf32>
    %489 = arith.subf %252, %488 : vector<16x32xf32>
    %490 = arith.mulf %489, %489 : vector<16x32xf32>
    %cst_269 = arith.constant dense<0.000000e+00> : vector<16xf32>
    %491 = vector.multi_reduction <add>, %490, %cst_269 [1] : vector<16x32xf32> to vector<16xf32>
    %492 = vector.shape_cast %491 : vector<16xf32> to vector<16x1xf32>
    %cst_270 = arith.constant 3.200000e+01 : f32
    %493 = vector.broadcast %cst_270 : f32 to vector<16x1xf32>
    %494 = arith.divf %492, %493 : vector<16x1xf32>
    %495 = vector.broadcast %487 : vector<16x1xf32> to vector<16x32xf32>
    %496 = arith.subf %252, %495 : vector<16x32xf32>
    %cst_271 = arith.constant 9.99999974E-6 : f32
    %497 = vector.broadcast %cst_271 : f32 to vector<16x1xf32>
    %498 = arith.addf %494, %497 : vector<16x1xf32>
    %499 = math.rsqrt %498 : vector<16x1xf32>
    %500 = vector.broadcast %499 : vector<16x1xf32> to vector<16x32xf32>
    %501 = arith.mulf %496, %500 : vector<16x32xf32>
    %502 = vector.broadcast %461 : vector<1x32xf32> to vector<16x32xf32>
    %503 = arith.mulf %501, %502 : vector<16x32xf32>
    %504 = vector.broadcast %463 : vector<1x32xf32> to vector<16x32xf32>
    %505 = arith.addf %503, %504 : vector<16x32xf32>
    %506 = arith.truncf %12 : vector<2x16xf32> to vector<2x16xbf16>
    %507 = arith.truncf %505 : vector<16x32xf32> to vector<16x32xbf16>
    %cst_272 = arith.constant dense<0.000000e+00> : vector<2x32xf32>
    %508 = tpu.matmul %506, %507, %cst_272 {dimension_numbers = #tpu.dot_dimension_numbers<[1], [0], [0], [1], [0, 0, 1, 1], [], []>} : vector<2x16xbf16>, vector<16x32xbf16>, vector<2x32xf32> -> vector<2x32xf32>
    %509 = arith.truncf %508 : vector<2x32xf32> to vector<2x32xbf16>
    %510 = arith.truncf %465 : vector<32x32xf32> to vector<32x32xbf16>
    %cst_273 = arith.constant dense<0.000000e+00> : vector<2x32xf32>
    %511 = tpu.matmul %509, %510, %cst_273 {dimension_numbers = #tpu.dot_dimension_numbers<[1], [0], [0], [1], [0, 0, 1, 1], [], []>} : vector<2x32xbf16>, vector<32x32xbf16>, vector<2x32xf32> -> vector<2x32xf32>
    %cst_274 = arith.constant 8.000000e+00 : f32
    %512 = vector.broadcast %cst_274 : f32 to vector<1x32xf32>
    %513 = arith.mulf %512, %467 : vector<1x32xf32>
    %514 = vector.broadcast %513 : vector<1x32xf32> to vector<2x32xf32>
    %515 = arith.addf %511, %514 : vector<2x32xf32>
    %516 = arith.truncf %515 : vector<2x32xf32> to vector<2x32xbf16>
    %517 = arith.truncf %469 : vector<32x32xf32> to vector<32x32xbf16>
    %cst_275 = arith.constant dense<0.000000e+00> : vector<2x32xf32>
    %518 = tpu.matmul %516, %517, %cst_275 {dimension_numbers = #tpu.dot_dimension_numbers<[1], [0], [0], [1], [0, 0, 1, 1], [], []>} : vector<2x32xbf16>, vector<32x32xbf16>, vector<2x32xf32> -> vector<2x32xf32>
    %519 = vector.broadcast %471 : vector<1x32xf32> to vector<2x32xf32>
    %520 = arith.addf %518, %519 : vector<2x32xf32>
    %521 = arith.truncf %51 : vector<16x2xf32> to vector<16x2xbf16>
    %522 = arith.truncf %520 : vector<2x32xf32> to vector<2x32xbf16>
    %cst_276 = arith.constant dense<0.000000e+00> : vector<16x32xf32>
    %523 = tpu.matmul %521, %522, %cst_276 {dimension_numbers = #tpu.dot_dimension_numbers<[1], [0], [0], [1], [0, 0, 1, 1], [], []>} : vector<16x2xbf16>, vector<2x32xbf16>, vector<16x32xf32> -> vector<16x32xf32>
    %524 = arith.addf %459, %523 : vector<16x32xf32>
    %cst_277 = arith.constant dense<0.000000e+00> : vector<16xf32>
    %525 = vector.multi_reduction <add>, %524, %cst_277 [1] : vector<16x32xf32> to vector<16xf32>
    %526 = vector.shape_cast %525 : vector<16xf32> to vector<16x1xf32>
    %cst_278 = arith.constant 3.200000e+01 : f32
    %527 = vector.broadcast %cst_278 : f32 to vector<16x1xf32>
    %528 = arith.divf %526, %527 : vector<16x1xf32>
    %529 = vector.broadcast %528 : vector<16x1xf32> to vector<16x32xf32>
    %530 = arith.subf %524, %529 : vector<16x32xf32>
    %531 = arith.mulf %530, %530 : vector<16x32xf32>
    %cst_279 = arith.constant dense<0.000000e+00> : vector<16xf32>
    %532 = vector.multi_reduction <add>, %531, %cst_279 [1] : vector<16x32xf32> to vector<16xf32>
    %533 = vector.shape_cast %532 : vector<16xf32> to vector<16x1xf32>
    %cst_280 = arith.constant 3.200000e+01 : f32
    %534 = vector.broadcast %cst_280 : f32 to vector<16x1xf32>
    %535 = arith.divf %533, %534 : vector<16x1xf32>
    %536 = vector.broadcast %528 : vector<16x1xf32> to vector<16x32xf32>
    %537 = arith.subf %524, %536 : vector<16x32xf32>
    %cst_281 = arith.constant 9.99999974E-6 : f32
    %538 = vector.broadcast %cst_281 : f32 to vector<16x1xf32>
    %539 = arith.addf %535, %538 : vector<16x1xf32>
    %540 = math.rsqrt %539 : vector<16x1xf32>
    %541 = vector.broadcast %540 : vector<16x1xf32> to vector<16x32xf32>
    %542 = arith.mulf %537, %541 : vector<16x32xf32>
    %543 = vector.broadcast %473 : vector<1x32xf32> to vector<16x32xf32>
    %544 = arith.mulf %542, %543 : vector<16x32xf32>
    %545 = vector.broadcast %475 : vector<1x32xf32> to vector<16x32xf32>
    %546 = arith.addf %544, %545 : vector<16x32xf32>
    %547 = arith.truncf %546 : vector<16x32xf32> to vector<16x32xbf16>
    %548 = arith.truncf %477 : vector<32x128xf32> to vector<32x128xbf16>
    %cst_282 = arith.constant dense<0.000000e+00> : vector<16x128xf32>
    %549 = tpu.matmul %547, %548, %cst_282 {dimension_numbers = #tpu.dot_dimension_numbers<[1], [0], [0], [1], [0, 0, 1, 1], [], []>} : vector<16x32xbf16>, vector<32x128xbf16>, vector<16x128xf32> -> vector<16x128xf32>
    %550 = vector.broadcast %479 : vector<1x128xf32> to vector<16x128xf32>
    %551 = arith.addf %549, %550 : vector<16x128xf32>
    %cst_283 = arith.constant 0.000000e+00 : f32
    %552 = vector.broadcast %cst_283 : f32 to vector<16x128xf32>
    %553 = arith.maximumf %551, %552 : vector<16x128xf32>
    %554 = arith.truncf %553 : vector<16x128xf32> to vector<16x128xbf16>
    %555 = arith.truncf %481 : vector<128x32xf32> to vector<128x32xbf16>
    %cst_284 = arith.constant dense<0.000000e+00> : vector<16x32xf32>
    %556 = tpu.matmul %554, %555, %cst_284 {dimension_numbers = #tpu.dot_dimension_numbers<[1], [0], [0], [1], [0, 0, 1, 1], [], []>} : vector<16x128xbf16>, vector<128x32xbf16>, vector<16x32xf32> -> vector<16x32xf32>
    %557 = arith.addf %524, %556 : vector<16x32xf32>
    %558 = vector.broadcast %483 : vector<1x32xf32> to vector<16x32xf32>
    %559 = arith.addf %557, %558 : vector<16x32xf32>
    %c0_285 = arith.constant 0 : index
    %c0_286 = arith.constant 0 : index
    %560 = vector.load %arg11[%c0_285, %c0_286] : memref<33x128xf32, #tpu.memory_space<vmem>>, vector<32x128xf32>
    %561 = arith.truncf %559 : vector<16x32xf32> to vector<16x32xbf16>
    %562 = arith.truncf %560 : vector<32x128xf32> to vector<32x128xbf16>
    %cst_287 = arith.constant dense<0.000000e+00> : vector<16x128xf32>
    %563 = tpu.matmul %561, %562, %cst_287 {dimension_numbers = #tpu.dot_dimension_numbers<[1], [0], [0], [1], [0, 0, 1, 1], [], []>} : vector<16x32xbf16>, vector<32x128xbf16>, vector<16x128xf32> -> vector<16x128xf32>
    %c32 = arith.constant 32 : index
    %c0_288 = arith.constant 0 : index
    %564 = vector.load %arg11[%c32, %c0_288] : memref<33x128xf32, #tpu.memory_space<vmem>>, vector<1x128xf32>
    %565 = vector.broadcast %564 : vector<1x128xf32> to vector<16x128xf32>
    %566 = arith.addf %563, %565 : vector<16x128xf32>
    %c0_289 = arith.constant 0 : index
    %c0_290 = arith.constant 0 : index
    %567 = vector.load %arg12[%c0_289, %c0_290] : memref<16x128xf32, #tpu.memory_space<vmem>>, vector<16x128xf32>
    tpu.vector_store %arg12[%c0_289, %c0_290], %566 {strides = array<i32>} : memref<16x128xf32, #tpu.memory_space<vmem>>, vector<16x128xf32>,
    return
  }
  func.func @transform_0(%arg0: i32) -> (i32, i32) {
    %c0_i32 = arith.constant 0 : i32
    %c0_i32_0 = arith.constant 0 : i32
    %c0_i32_1 = arith.constant 0 : i32
    return %c0_i32, %c0_i32_0 : i32, i32
  }
  func.func @transform_1(%arg0: i32) -> (i32, i32) {
    %c0_i32 = arith.constant 0 : i32
    %c0_i32_0 = arith.constant 0 : i32
    %c0_i32_1 = arith.constant 0 : i32
    return %c0_i32, %c0_i32_0 : i32, i32
  }
  func.func @transform_2(%arg0: i32) -> (i32, i32, i32, i32) {
    %c0_i32 = arith.constant 0 : i32
    %c0_i32_0 = arith.constant 0 : i32
    %c0_i32_1 = arith.constant 0 : i32
    %c0_i32_2 = arith.constant 0 : i32
    %c0_i32_3 = arith.constant 0 : i32
    return %c0_i32, %c0_i32_0, %c0_i32_1, %c0_i32_2 : i32, i32, i32, i32
  }
  func.func @transform_3(%arg0: i32) -> (i32, i32, i32) {
    %c0_i32 = arith.constant 0 : i32
    %c0_i32_0 = arith.constant 0 : i32
    %c0_i32_1 = arith.constant 0 : i32
    %c0_i32_2 = arith.constant 0 : i32
    return %c0_i32, %c0_i32_0, %c0_i32_1 : i32, i32, i32
  }
  func.func @transform_4(%arg0: i32) -> (i32, i32, i32) {
    %c0_i32 = arith.constant 0 : i32
    %c0_i32_0 = arith.constant 0 : i32
    %c0_i32_1 = arith.constant 0 : i32
    %c0_i32_2 = arith.constant 0 : i32
    return %c0_i32, %c0_i32_0, %c0_i32_1 : i32, i32, i32
  }
  func.func @transform_5(%arg0: i32) -> (i32, i32, i32) {
    %c0_i32 = arith.constant 0 : i32
    %c0_i32_0 = arith.constant 0 : i32
    %c0_i32_1 = arith.constant 0 : i32
    %c0_i32_2 = arith.constant 0 : i32
    return %c0_i32, %c0_i32_0, %c0_i32_1 : i32, i32, i32
  }
  func.func @transform_6(%arg0: i32) -> (i32, i32, i32, i32) {
    %c0_i32 = arith.constant 0 : i32
    %c0_i32_0 = arith.constant 0 : i32
    %c0_i32_1 = arith.constant 0 : i32
    %c0_i32_2 = arith.constant 0 : i32
    %c0_i32_3 = arith.constant 0 : i32
    return %c0_i32, %c0_i32_0, %c0_i32_1, %c0_i32_2 : i32, i32, i32, i32
  }
  func.func @transform_7(%arg0: i32) -> (i32, i32, i32) {
    %c0_i32 = arith.constant 0 : i32
    %c0_i32_0 = arith.constant 0 : i32
    %c0_i32_1 = arith.constant 0 : i32
    %c0_i32_2 = arith.constant 0 : i32
    return %c0_i32, %c0_i32_0, %c0_i32_1 : i32, i32, i32
  }
  func.func @transform_8(%arg0: i32) -> (i32, i32, i32) {
    %c0_i32 = arith.constant 0 : i32
    %c0_i32_0 = arith.constant 0 : i32
    %c0_i32_1 = arith.constant 0 : i32
    %c0_i32_2 = arith.constant 0 : i32
    return %c0_i32, %c0_i32_0, %c0_i32_1 : i32, i32, i32
  }
  func.func @transform_9(%arg0: i32) -> (i32, i32, i32) {
    %c0_i32 = arith.constant 0 : i32
    %c0_i32_0 = arith.constant 0 : i32
    %c0_i32_1 = arith.constant 0 : i32
    %c0_i32_2 = arith.constant 0 : i32
    return %c0_i32, %c0_i32_0, %c0_i32_1 : i32, i32, i32
  }
  func.func @transform_10(%arg0: i32) -> (i32, i32) {
    %c0_i32 = arith.constant 0 : i32
    %c0_i32_0 = arith.constant 0 : i32
    %c0_i32_1 = arith.constant 0 : i32
    return %c0_i32, %c0_i32_0 : i32, i32
  }
  func.func @transform_11(%arg0: i32) -> (i32, i32) {
    %c0_i32 = arith.constant 0 : i32
    %c0_i32_0 = arith.constant 0 : i32
    %c0_i32_1 = arith.constant 0 : i32
    return %c0_i32, %c0_i32_0 : i32, i32
  }
}

</mosaic_0001>

<bundles_post_ra>
// kernel: transformer_forward.1
= control target key start
LH: loop header
LB: loop body
LE: loop exit
PB: predicated region body
PF: predicated region fallthrough
CT: control target
= control target key end

     0   :  { %vm98_vm0 = vcmask 261120   ;;  %v2864_v14 = vmov 0.0   ;;  %vm2865_vm1 = vmmov 0   ;;  %v39_v23 = vlaneseq  ;;  %s3818_s0 = inlined_call_operand.vmem [shape: f32[16,32], index: 0, kind: input, shape index: {}]   ;;  %s3819_s2 = inlined_call_operand.vmem [shape: f32[2,2,32,32], index: 2, kind: input, shape index: {}]   ;;  %s3820_s5 = inlined_call_operand.vmem [shape: f32[2,8,128], index: 5, kind: input, shape index: {}]   ;;  %s3821_s3 = inlined_call_operand.vmem [shape: f32[2,32,128], index: 3, kind: input, shape index: {}]   ;;  %s3822_s4 = inlined_call_operand.vmem [shape: f32[2,128,32], index: 4, kind: input, shape index: {}]   ;;  %s3823_s1 = inlined_call_operand.vmem [shape: f32[16,32], index: 1, kind: input, shape index: {}]   ;;  %s3824_s9 = inlined_call_operand.vmem [shape: f32[2,12,128], index: 9, kind: input, shape index: {}]   ;;  %s3825_s6 = inlined_call_operand.vmem [shape: f32[2,4,32,32], index: 6, kind: input, shape index: {}]   ;;  %s3826_s7 = inlined_call_operand.vmem [shape: f32[2,32,128], index: 7, kind: input, shape index: {}]   ;;  %s3827_s8 = inlined_call_operand.vmem [shape: f32[2,128,32], index: 8, kind: input, shape index: {}]   ;;  %s3828_s10 = inlined_call_operand.vmem [shape: f32[33,128], index: 10, kind: input, shape index: {}]   ;;  %s3829_s11 = inlined_call_operand.vmem [shape: f32[16,128], index: 11, kind: output, shape index: {}]  }
   0x1   :  { %v2929_v0 = vld [vmem:[%s3818_s0] sm:$0xff]  ;;  %v2934_v1 = vld [vmem:[%s3818_s0 + $0x8] sm:$0xff]  ;;  %2538 = vmatprep.subr.bf16.mxu0 %v2864_v14  ;;  %2544 = vmatprep.subr.bf16.mxu1 %v2864_v14  ;;  %v65_v15 = vld [vmem:[%s3819_s2 + $0x10] sm:$0xff]  ;;  %vm142_vm5 = vcmask 130048   ;;  %vm297_vm12 = vcmask 1040384   ;;  %vm293_vm13 = vcmask 15360  }
   0x2   :  { %v99_v2 = vsel %vm98_vm0, %v2929_v0, 0.0  ;;  %v102_v3 = vsel %vm98_vm0, %v2934_v1, 0.0  ;;  %2540 = vmatprep.mubr.msk.bf16.mxu0 %vm2865_vm1, %v2864_v14  ;;  %2548 = vmatprep.mubr.msk.bf16.mxu1 %vm2865_vm1, %v2864_v14  ;;  %v66_v16 = vld [vmem:[%s3819_s2 + $0x18] sm:$0xff]  ;;  %v2957_v25 = vshrl.u32 %v39_v23, 7  ;;  %v2960_v27 = vand.u32 127, %v39_v23  ;;  %v63_v43 = vld [vmem:[%s3819_s2] sm:$0xff] }
   0x3   :  { %100 = vadd.xlane.f32.xlu0 %v99_v2  ;;  %v188_v17 = vpack.c.bf16 %v66_v16, %v65_v15  ;;  %v2264_v32 = vld [vmem:[%s3820_s5] ss:$0 sm:$0xff]  ;;  %v2265_v36 = vld [vmem:[%s3820_s5 + $0x1] ss:$0 sm:$0xff]  ;;  %v64_v44 = vld [vmem:[%s3819_s2 + $0x8] sm:$0xff] }
   0x4   :  { %v45_v26 = vadd.s32 1, %v2957_v25  ;;  %v43_v28 = vmul.u32 8, %v2957_v25  ;;  %v187_v45 = vpack.c.bf16 %v64_v44, %v63_v43  ;;  %v2262_v46 = vld [vmem:[%s3819_s2 + $0x30] sm:$0xff]  ;;  %v2263_v47 = vld [vmem:[%s3819_s2 + $0x38] sm:$0xff]  ;;  %v2260_v54 = vld [vmem:[%s3819_s2 + $0x20] sm:$0xff]  ;;  %v3007_v59 = vsub.s32 0, %v2957_v25 }
   0x5   :  { %2545 = vmatpush3.bf16.msra.mxu1 %v188_v17  ;;  %v239_v49 = vpack.c.bf16 %v2263_v47, %v2262_v46  ;;  %v2261_v55 = vld [vmem:[%s3819_s2 + $0x28] sm:$0xff]  ;;  %v67_v57 = vld [vmem:[%s3820_s5 + $0x2] sm:$0x1]  ;;  %v95_v44 = vld [vmem:[%s3822_s4 + $0x70] sm:$0xff] }
   0x6   :  { %2546 = vmatprep.subr.bf16.mxu1 %v2864_v14  ;;  %v46_v29 = vmul.u32 8, %v45_v26  ;;  %vm44_vm2 = vcmp.ge.s32.totalorder %v2960_v27, %v43_v28  ;;  %v238_v56 = vpack.c.bf16 %v2261_v55, %v2260_v54  ;;  %v189_v58 = vmul.f32 8.0, %v67_v57  ;;  %v93_v46 = vld [vmem:[%s3822_s4 + $0x60] sm:$0xff]  ;;  %v90_v54 = vld [vmem:[%s3822_s4 + $0x48] sm:$0xff]  ;;  %v88_v57 = vld [vmem:[%s3822_s4 + $0x38] sm:$0xff] }
   0x7   :  { %103 = vadd.xlane.f32.xlu0 %v102_v3 }
   0x8   :  { %vm47_vm3 = vcmp.lt.s32.totalorder %v2960_v27, %v46_v29  ;;  %v193_v60 = vrot.slane %v189_v58, %v3007_v59 }
   0x9   :  { %vm48_vm4 = vmand %vm44_vm2, %vm47_vm3  ;;  %2547 = vmatpush3.bf16.msra.mxu1 %v187_v45  ;;  %v96_v45 = vld [vmem:[%s3822_s4 + $0x78] sm:$0xff] }
   0xa   :  { %v2266_v40 = vsel %vm48_vm4, 1.0, %v2864_v14  ;;  %2552 = vmatprep.subr.bf16.mxu1 %v2864_v14  ;;  %v443_v47 = vpack.c.bf16 %v96_v45, %v95_v44 }
   0xb   :  { %v2972_v42 = vpack.c.bf16 %v2266_v40, %v2266_v40  ;;  %v76_v40 = vld [vmem:[%s3821_s3] sm:$0xff] }
  0x8c   :  { %v101_v4 = vpop.xlane.xlu0 %100 }
  0x8d   :  { %v106_v5 = vmul.f32 0.03125, %v101_v4 }
  0x8f   :  { %v108_v6 = vsub.f32 %v2929_v0, %v106_v5  ;;  %v53_v5 = vadd.s32 1, %v2960_v27 }
  0x90   :  { %v104_v7 = vpop.xlane.xlu0 %103 }
  0x91   :  { %v107_v8 = vmul.f32 0.03125, %v104_v7  ;;  %v110_v9 = vmul.f32 %v108_v6, %v108_v6  ;;  %v54_v7 = vmul.u32 8, %v53_v5 }
  0x93   :  { %v109_v10 = vsub.f32 %v2934_v1, %v107_v8  ;;  %v112_v11 = vsel %vm98_vm0, %v110_v9, 0.0  ;;  %v49_v8 = vadd.s32 8, %v2957_v25  ;;  %vm55_vm7 = vcmp.lt.s32.totalorder %v2957_v25, %v54_v7  ;;  %v2269_v9 = vld [vmem:[%s3820_s5 + $0x3] ss:$0 sm:$0xff] }
  0x94   :  { %113 = vadd.xlane.f32.xlu1 %v112_v11 }
  0x95   :  { %v111_v12 = vmul.f32 %v109_v10, %v109_v10  ;;  %vm56_vm9 = vcmp.lt.s32.totalorder %v49_v8, %v54_v7 }
  0x97   :  { %v115_v13 = vsel %vm98_vm0, %v111_v12, 0.0 }
  0x98   :  { %116 = vadd.xlane.f32.xlu1 %v115_v13 }
 0x11d   :  { %v114_v18 = vpop.xlane.xlu1 %113 }
 0x11e   :  { %v118_v19 = vmul.f32 0.03125, %v114_v18 }
 0x120   :  { %v120_v20 = vadd.f32 1e-05, %v118_v19 }
 0x121   :  { %v117_v21 = vpop.xlane.xlu1 %116 }
 0x122   :  { %2828 = vrsqrt.f32 %v120_v20  ;;  %v119_v22 = vmul.f32 0.03125, %v117_v21 }
 0x124   :  { %v121_v24 = vadd.f32 1e-05, %v119_v22 }
 0x126   :  { %2830 = vrsqrt.f32 %v121_v24 }
 0x12f   :  { %v2829_v30 = vpop.eup %2828 }
 0x130   :  { %v124_v31 = vmul.f32 %v2829_v30, %v108_v6  ;;  %v50_v6 = vmul.u32 8, %v2960_v27 }
 0x132   :  { %v130_v35 = vmul.f32 %v2264_v32, %v124_v31  ;;  %vm51_vm6 = vcmp.ge.s32.totalorder %v2957_v25, %v50_v6  ;;  %vm52_vm8 = vcmp.ge.s32.totalorder %v49_v8, %v50_v6  ;;  %v2274_v6 = vld [vmem:[%s3820_s5 + $0x4] ss:$0 sm:$0xff] }
 0x133   :  { %v2831_v33 = vpop.eup %2830  ;;  %vm57_vm10 = vmand %vm51_vm6, %vm55_vm7 }
 0x134   :  { %v125_v34 = vmul.f32 %v2831_v33, %v109_v10  ;;  %v136_v38 = vadd.f32 %v2265_v36, %v130_v35  ;;  %vm58_vm11 = vmand %vm52_vm8, %vm56_vm9  ;;  %v2271_v13 = vsel %vm57_vm10, 1.0, %v2864_v14 }
 0x135   :  { %v2272_v15 = vsel %vm58_vm11, 1.0, %v2864_v14 }
 0x136   :  { %v131_v37 = vmul.f32 %v2264_v32, %v125_v34  ;;  %v3024_v19 = vpack.c.bf16 %v2272_v15, %v2271_v13 }
 0x138   :  { %v137_v39 = vadd.f32 %v2265_v36, %v131_v37  ;;  %v78_v37 = vld [vmem:[%s3821_s3 + $0x10] sm:$0xff] }
 0x13a   :  { %v141_v41 = vpack.c.bf16 %v137_v39, %v136_v38  ;;  %v79_v38 = vld [vmem:[%s3821_s3 + $0x18] sm:$0xff] }
 0x13b   :  { %v384_v39 = vpack.c.bf16 %v79_v38, %v78_v37 }
 0x13c   :  { %2539 = vmatpush3.bf16.msra.mxu0 %v141_v41  ;;  %v77_v41 = vld [vmem:[%s3821_s3 + $0x8] sm:$0xff] }
 0x13d   :  { %2566 = vmatprep.subr.bf16.mxu0 %v2864_v14  ;;  %v383_v43 = vpack.c.bf16 %v77_v41, %v76_v40 }
 0x13f   :  { %2541 = vmatmul.mubr.msk.bf16.vlgmr.msra.gmra.mxu0 %vm142_vm5, %v2972_v42 }
 0x140   :  { %2570 = vmatprep.mubr.msk.bf16.mxu0 %vm2865_vm1, %v2864_v14  ;;  %2567 = vmatpush3.bf16.msra.mxu0 %v384_v39 }
 0x141   :  { %2568 = vmatprep.subr.bf16.mxu0 %v2864_v14 }
 0x144   :  { %2569 = vmatpush3.bf16.msra.mxu0 %v383_v43 }
 0x145   :  { %2594 = vmatprep.subr.bf16.mxu0 %v2864_v14 }
 0x1ff   :  { %v180_v48 = vpop.f32.mrf.mxu0 }
 0x200   :  { %v186_v50 = vpack.c.bf16 %v180_v48, %v180_v48  ;;  %v94_v48 = vld [vmem:[%s3822_s4 + $0x68] sm:$0xff] }
 0x201   :  { %v2542_v51 = vpop.f32.mrf.mxu0 }
 0x202   :  { %2549 = vmatmul.mubr.msk.bf16.vlgmr.msra.gmra.mxu1 %vm98_vm0, %v186_v50  ;;  %v91_v50 = vld [vmem:[%s3822_s4 + $0x50] sm:$0xff]  ;;  %v92_v51 = vld [vmem:[%s3822_s4 + $0x58] sm:$0xff] }
 0x203   :  { %v183_v52 = vpop.f32.mrf.mxu0  ;;  %2553 = vmatpush3.bf16.msra.mxu1 %v239_v49  ;;  %2556 = vmatprep.mubr.msk.bf16.mxu1 %vm2865_vm1, %v2864_v14  ;;  %v442_v49 = vpack.c.bf16 %v94_v48, %v93_v46 }
 0x204   :  { %2554 = vmatprep.subr.bf16.mxu1 %v2864_v14  ;;  %v441_v52 = vpack.c.bf16 %v92_v51, %v91_v50 }
 0x205   :  { %v2543_v53 = vpop.f32.mrf.mxu0 }
 0x206   :  { %v89_v53 = vld [vmem:[%s3822_s4 + $0x40] sm:$0xff] }
 0x207   :  { %2555 = vmatpush3.bf16.msra.mxu1 %v238_v56  ;;  %v440_v55 = vpack.c.bf16 %v90_v54, %v89_v53  ;;  %v87_v56 = vld [vmem:[%s3822_s4 + $0x30] sm:$0xff] }
 0x208   :  { %2560 = vmatprep.subr.bf16.mxu1 %v2864_v14  ;;  %v439_v58 = vpack.c.bf16 %v88_v57, %v87_v56 }
 0x2c2   :  { %v231_v61 = vpop.f32.mrf.mxu1 }
 0x2c3   :  { %v232_v62 = vadd.f32 %v231_v61, %v193_v60 }
 0x2c4   :  { %v2550_v63 = vpop.f32.mrf.mxu1 }
 0x2c5   :  { %v237_v2 = vpack.c.bf16 %v232_v62, %v232_v62 }
 0x2c6   :  { %v234_v3 = vpop.f32.mrf.mxu1 }
 0x2c7   :  { %2557 = vmatmul.mubr.msk.bf16.vlgmr.msra.gmra.mxu1 %vm98_vm0, %v237_v2 }
 0x2c8   :  { %v2551_v4 = vpop.f32.mrf.mxu1  ;;  %2562 = vmatprep.mubr.msk.bf16.mxu1 %vm2865_vm1, %v2864_v14 }
 0x387   :  { %v281_v10 = vpop.f32.mrf.mxu1 }
 0x388   :  { %v282_v11 = vadd.f32 %v2269_v9, %v281_v10  ;;  %v2275_v10 = vld [vmem:[%s3820_s5 + $0x5] ss:$0 sm:$0xff] }
 0x389   :  { %v2558_v12 = vpop.f32.mrf.mxu1 }
 0x38a   :  { %v292_v16 = vpack.c.bf16 %v282_v11, %v282_v11 }
 0x38b   :  { %v284_v17 = vpop.f32.mrf.mxu1 }
 0x38c   :  { %v299_v18 = vsel %vm297_vm12, %v292_v16, 0  ;;  %v85_v16 = vld [vmem:[%s3822_s4 + $0x20] sm:$0xff]  ;;  %v86_v17 = vld [vmem:[%s3822_s4 + $0x28] sm:$0xff] }
 0x38d   :  { %v2559_v20 = vpop.f32.mrf.mxu1  ;;  %2561 = vmatpush3.bf16.msra.mxu1 %v299_v18  ;;  %v438_v18 = vpack.c.bf16 %v86_v17, %v85_v16  ;;  %v2281_v16 = vld [vmem:[%s3819_s2 + $0x40] sm:$0xff]  ;;  %v2282_v17 = vld [vmem:[%s3819_s2 + $0x48] sm:$0xff] }
 0x38e   :  { %2574 = vmatprep.subr.bf16.mxu1 %v2864_v14  ;;  %v83_v20 = vld [vmem:[%s3822_s4 + $0x10] sm:$0xff] }
 0x390   :  { %2563 = vmatmul.mubr.msk.bf16.vlgmr.msra.gmra.mxu1 %vm293_vm13, %v3024_v19 }
 0x391   :  { %2590 = vmatprep.mubr.msk.bf16.mxu1 %vm2865_vm1, %v2864_v14  ;;  %2575 = vmatpush3.bf16.msra.mxu1 %v443_v47 }
 0x392   :  { %2576 = vmatprep.subr.bf16.mxu1 %v2864_v14 }
 0x395   :  { %2577 = vmatpush3.bf16.msra.mxu1 %v442_v49 }
 0x396   :  { %2578 = vmatprep.subr.bf16.mxu1 %v2864_v14 }
 0x399   :  { %2579 = vmatpush3.bf16.msra.mxu1 %v441_v52 }
 0x39a   :  { %2580 = vmatprep.subr.bf16.mxu1 %v2864_v14 }
 0x39d   :  { %2581 = vmatpush3.bf16.msra.mxu1 %v440_v55 }
 0x39e   :  { %2582 = vmatprep.subr.bf16.mxu1 %v2864_v14 }
 0x3a1   :  { %2583 = vmatpush3.bf16.msra.mxu1 %v439_v58 }
 0x3a2   :  { %2584 = vmatprep.subr.bf16.mxu1 %v2864_v14 }
 0x3a5   :  { %2585 = vmatpush3.bf16.msra.mxu1 %v438_v18  ;;  %v614_v18 = vpack.c.bf16 %v2282_v17, %v2281_v16 }
 0x3a6   :  { %2586 = vmatprep.subr.bf16.mxu1 %v2864_v14 }
 0x450   :  { %v335_v21 = vpop.f32.mrf.mxu1 }
 0x451   :  { %v3032_v22 = vadd.f32 %v335_v21, %v2929_v0  ;;  %v84_v21 = vld [vmem:[%s3822_s4 + $0x18] sm:$0xff] }
 0x452   :  { %v2564_v23 = vpop.f32.mrf.mxu1 }
 0x453   :  { %v344_v24 = vsel %vm98_vm0, %v3032_v22, 0.0  ;;  %v437_v23 = vpack.c.bf16 %v84_v21, %v83_v20  ;;  %v2288_v20 = vld [vmem:[%s3819_s2 + $0x70] sm:$0xff]  ;;  %v2289_v21 = vld [vmem:[%s3819_s2 + $0x78] sm:$0xff] }
 0x454   :  { %345 = vadd.xlane.f32.xlu0 %v344_v24  ;;  %v338_v25 = vpop.f32.mrf.mxu1  ;;  %v81_v24 = vld [vmem:[%s3822_s4] sm:$0xff] }
 0x455   :  { %v3037_v26 = vadd.f32 %v338_v25, %v2934_v1  ;;  %2587 = vmatpush3.bf16.msra.mxu1 %v437_v23  ;;  %v82_v25 = vld [vmem:[%s3822_s4 + $0x8] sm:$0xff] }
 0x456   :  { %v2565_v27 = vpop.f32.mrf.mxu1  ;;  %2588 = vmatprep.subr.bf16.mxu1 %v2864_v14 }
 0x457   :  { %v347_v28 = vsel %vm98_vm0, %v3037_v26, 0.0  ;;  %v436_v27 = vpack.c.bf16 %v82_v25, %v81_v24  ;;  %v666_v24 = vpack.c.bf16 %v2289_v21, %v2288_v20 }
 0x458   :  { %348 = vadd.xlane.f32.xlu1 %v347_v28  ;;  %v2276_v28 = vld [vmem:[%s3820_s5 + $0x7] ss:$0 sm:$0xff] }
 0x459   :  { %2589 = vmatpush3.bf16.msra.mxu1 %v436_v27 }
 0x45a   :  { %2622 = vmatprep.subr.bf16.mxu1 %v2864_v14 }
 0x4dd   :  { %v346_v29 = vpop.xlane.xlu0 %345 }
 0x4de   :  { %v350_v30 = vmul.f32 0.03125, %v346_v29 }
 0x4e0   :  { %v352_v31 = vsub.f32 %v3032_v22, %v350_v30 }
 0x4e1   :  { %v349_v0 = vpop.xlane.xlu1 %348 }
 0x4e2   :  { %v351_v32 = vmul.f32 0.03125, %v349_v0  ;;  %v354_v33 = vmul.f32 %v352_v31, %v352_v31 }
 0x4e4   :  { %v353_v34 = vsub.f32 %v3037_v26, %v351_v32  ;;  %v356_v35 = vsel %vm98_vm0, %v354_v33, 0.0 }
 0x4e5   :  { %357 = vadd.xlane.f32.xlu0 %v356_v35 }
 0x4e6   :  { %v355_v36 = vmul.f32 %v353_v34, %v353_v34 }
 0x4e8   :  { %v359_v1 = vsel %vm98_vm0, %v355_v36, 0.0 }
 0x4e9   :  { %360 = vadd.xlane.f32.xlu1 %v359_v1  ;;  %v2278_v1 = vld [vmem:[%s3820_s5 + $0x6] ss:$0 sm:$0xff] }
 0x56e   :  { %v358_v60 = vpop.xlane.xlu0 %357 }
 0x56f   :  { %v362_v61 = vmul.f32 0.03125, %v358_v60 }
 0x571   :  { %v364_v62 = vadd.f32 1e-05, %v362_v61 }
 0x572   :  { %v361_v63 = vpop.xlane.xlu1 %360 }
 0x573   :  { %2832 = vrsqrt.f32 %v364_v62  ;;  %v363_v2 = vmul.f32 0.03125, %v361_v63 }
 0x575   :  { %v365_v3 = vadd.f32 1e-05, %v363_v2 }
 0x577   :  { %2834 = vrsqrt.f32 %v365_v3  ;;  %v2315_v3 = vld [vmem:[%s3820_s5 + $0x8] ss:$0 sm:$0xff] }
 0x580   :  { %v2833_v4 = vpop.eup %2832 }
 0x581   :  { %v368_v5 = vmul.f32 %v2833_v4, %v352_v31 }
 0x583   :  { %v374_v9 = vmul.f32 %v2274_v6, %v368_v5 }
 0x584   :  { %v2835_v7 = vpop.eup %2834 }
 0x585   :  { %v369_v8 = vmul.f32 %v2835_v7, %v353_v34  ;;  %v380_v12 = vadd.f32 %v2275_v10, %v374_v9  ;;  %v2316_v7 = vld [vmem:[%s3820_s5 + $0x9] ss:$0 sm:$0xff] }
 0x587   :  { %v375_v11 = vmul.f32 %v2274_v6, %v369_v8 }
 0x589   :  { %v381_v13 = vadd.f32 %v2275_v10, %v375_v11  ;;  %v2283_v11 = vld [vmem:[%s3819_s2 + $0x50] sm:$0xff] }
 0x58b   :  { %v382_v15 = vpack.c.bf16 %v381_v13, %v380_v12  ;;  %v2284_v12 = vld [vmem:[%s3819_s2 + $0x58] sm:$0xff] }
 0x58d   :  { %2571 = vmatmul.mubr.msk.bf16.vlgmr.msra.gmra.mxu0 %vm98_vm0, %v382_v15  ;;  %v615_v15 = vpack.c.bf16 %v2284_v12, %v2283_v11  ;;  %v2293_v11 = vld [vmem:[%s3821_s3 + $0x20] sm:$0xff]  ;;  %v2294_v12 = vld [vmem:[%s3821_s3 + $0x28] sm:$0xff] }
 0x58e   :  { %2596 = vmatprep.mubr.msk.bf16.mxu0 %vm2865_vm1, %v2864_v14 }
 0x64d   :  { %v426_v29 = vpop.f32.mrf.mxu0 }
 0x64e   :  { %v427_v31 = vadd.f32 %v2276_v28, %v426_v29 }
 0x64f   :  { %v2572_v30 = vpop.f32.mrf.mxu0 }
 0x650   :  { %v433_v34 = vmax.f32 %v427_v31, 0.0  ;;  %v2286_v30 = vld [vmem:[%s3819_s2 + $0x60] sm:$0xff]  ;;  %v2287_v31 = vld [vmem:[%s3819_s2 + $0x68] sm:$0xff] }
 0x651   :  { %v429_v0 = vpop.f32.mrf.mxu0 }
 0x652   :  { %v430_v32 = vadd.f32 %v2276_v28, %v429_v0  ;;  %v665_v0 = vpack.c.bf16 %v2287_v31, %v2286_v30 }
 0x653   :  { %v2573_v33 = vpop.f32.mrf.mxu0 }
 0x654   :  { %v434_v35 = vmax.f32 %v430_v32, 0.0  ;;  %v2285_v32 = vld [vmem:[%s3820_s5 + $0xa] sm:$0x1] }
 0x655   :  { %v616_v33 = vmul.f32 8.0, %v2285_v32 }
 0x656   :  { %v435_v36 = vpack.c.bf16 %v434_v35, %v433_v34 }
 0x657   :  { %v620_v34 = vrot.slane %v616_v33, %v3007_v59 }
 0x658   :  { %2591 = vmatmul.mubr.bf16.vlgmr.msra.gmra.mxu1 %v435_v36 }
 0x659   :  { %2626 = vmatprep.mubr.msk.bf16.mxu1 %vm2865_vm1, %v2864_v14 }
 0x718   :  { %v478_v37 = vpop.f32.mrf.mxu1 }
 0x719   :  { %v485_v38 = vadd.f32 %v478_v37, %v3032_v22 }
 0x71a   :  { %v2592_v39 = vpop.f32.mrf.mxu1 }
 0x71b   :  { %v3133_v40 = vadd.f32 %v2278_v1, %v485_v38 }
 0x71c   :  { %v481_v41 = vpop.f32.mrf.mxu1 }
 0x71d   :  { %v486_v43 = vadd.f32 %v481_v41, %v3037_v26  ;;  %v534_v44 = vsel %vm98_vm0, %v3133_v40, 0.0  ;;  %v2319_v41 = vld [vmem:[%s3820_s5 + $0xb] ss:$0 sm:$0xff] }
 0x71e   :  { %535 = vadd.xlane.f32.xlu0 %v534_v44  ;;  %v2593_v45 = vpop.f32.mrf.mxu1 }
 0x71f   :  { %v3138_v46 = vadd.f32 %v2278_v1, %v486_v43 }
 0x721   :  { %v537_v47 = vsel %vm98_vm0, %v3138_v46, 0.0 }
 0x722   :  { %538 = vadd.xlane.f32.xlu1 %v537_v47 }
 0x7a7   :  { %v536_v48 = vpop.xlane.xlu0 %535 }
 0x7a8   :  { %v540_v49 = vmul.f32 0.03125, %v536_v48 }
 0x7aa   :  { %v542_v22 = vsub.f32 %v3133_v40, %v540_v49 }
 0x7ab   :  { %v539_v50 = vpop.xlane.xlu1 %538 }
 0x7ac   :  { %v541_v51 = vmul.f32 0.03125, %v539_v50  ;;  %v544_v52 = vmul.f32 %v542_v22, %v542_v22 }
 0x7ae   :  { %v543_v26 = vsub.f32 %v3138_v46, %v541_v51  ;;  %v546_v53 = vsel %vm98_vm0, %v544_v52, 0.0 }
 0x7af   :  { %547 = vadd.xlane.f32.xlu0 %v546_v53 }
 0x7b0   :  { %v545_v54 = vmul.f32 %v543_v26, %v543_v26 }
 0x7b2   :  { %v549_v55 = vsel %vm98_vm0, %v545_v54, 0.0 }
 0x7b3   :  { %550 = vadd.xlane.f32.xlu1 %v549_v55 }
 0x838   :  { %v548_v56 = vpop.xlane.xlu0 %547 }
 0x839   :  { %v552_v57 = vmul.f32 0.03125, %v548_v56 }
 0x83b   :  { %v554_v58 = vadd.f32 1e-05, %v552_v57 }
 0x83c   :  { %v551_v60 = vpop.xlane.xlu1 %550 }
 0x83d   :  { %2836 = vrsqrt.f32 %v554_v58  ;;  %v553_v61 = vmul.f32 0.03125, %v551_v60 }
 0x83f   :  { %v555_v62 = vadd.f32 1e-05, %v553_v61 }
 0x841   :  { %2838 = vrsqrt.f32 %v555_v62 }
 0x84a   :  { %v2837_v63 = vpop.eup %2836 }
 0x84b   :  { %v558_v2 = vmul.f32 %v2837_v63, %v542_v22  ;;  %v3218_v63 = vld [vmem:[%s3823_s1] sm:$0xff] }
 0x84d   :  { %v564_v6 = vmul.f32 %v2315_v3, %v558_v2 }
 0x84e   :  { %v2839_v4 = vpop.eup %2838 }
 0x84f   :  { %v559_v5 = vmul.f32 %v2839_v4, %v543_v26  ;;  %v570_v9 = vadd.f32 %v2316_v7, %v564_v6  ;;  %v925_v4 = vsel %vm98_vm0, %v3218_v63, 0.0 }
 0x851   :  { %v565_v8 = vmul.f32 %v2315_v3, %v559_v5  ;;  %v3227_v5 = vld [vmem:[%s3823_s1 + $0x8] sm:$0xff] }
 0x853   :  { %v571_v10 = vadd.f32 %v2316_v7, %v565_v8  ;;  %v928_v7 = vsel %vm98_vm0, %v3227_v5, 0.0  ;;  %v2295_v8 = vld [vmem:[%s3821_s3 + $0x30] sm:$0xff] }
 0x855   :  { %v572_v13 = vpack.c.bf16 %v571_v10, %v570_v9  ;;  %v2296_v9 = vld [vmem:[%s3821_s3 + $0x38] sm:$0xff] }
 0x856   :  { %v801_v10 = vpack.c.bf16 %v2296_v9, %v2295_v8 }
 0x857   :  { %2595 = vmatpush3.bf16.msra.mxu0 %v572_v13  ;;  %v800_v13 = vpack.c.bf16 %v2294_v12, %v2293_v11 }
 0x858   :  { %2600 = vmatprep.subr.bf16.mxu0 %v2864_v14  ;;  %2623 = vmatpush3.bf16.msra.mxu1 %v801_v10 }
 0x859   :  { %2624 = vmatprep.subr.bf16.mxu1 %v2864_v14 }
 0x85a   :  { %2597 = vmatmul.mubr.msk.bf16.vlgmr.msra.gmra.mxu0 %vm142_vm5, %v2972_v42 }
 0x85b   :  { %2601 = vmatpush3.bf16.msra.mxu0 %v615_v15  ;;  %2604 = vmatprep.mubr.msk.bf16.mxu0 %vm2865_vm1, %v2864_v14 }
 0x85c   :  { %2602 = vmatprep.subr.bf16.mxu0 %v2864_v14  ;;  %2625 = vmatpush3.bf16.msra.mxu1 %v800_v13 }
 0x85d   :  { %2650 = vmatprep.subr.bf16.mxu1 %v2864_v14 }
 0x85f   :  { %2603 = vmatpush3.bf16.msra.mxu0 %v614_v18 }
 0x860   :  { %2608 = vmatprep.subr.bf16.mxu0 %v2864_v14 }
 0x91a   :  { %v607_v23 = vpop.f32.mrf.mxu0 }
 0x91b   :  { %v613_v25 = vpack.c.bf16 %v607_v23, %v607_v23 }
 0x91c   :  { %v2598_v27 = vpop.f32.mrf.mxu0 }
 0x91d   :  { %2605 = vmatmul.mubr.msk.bf16.vlgmr.msra.gmra.mxu0 %vm98_vm0, %v613_v25 }
 0x91e   :  { %v610_v28 = vpop.f32.mrf.mxu0  ;;  %2609 = vmatpush3.bf16.msra.mxu0 %v666_v24  ;;  %2612 = vmatprep.mubr.msk.bf16.mxu0 %vm2865_vm1, %v2864_v14 }
 0x91f   :  { %2610 = vmatprep.subr.bf16.mxu0 %v2864_v14 }
 0x920   :  { %v2599_v29 = vpop.f32.mrf.mxu0 }
 0x922   :  { %2611 = vmatpush3.bf16.msra.mxu0 %v665_v0 }
 0x923   :  { %2616 = vmatprep.subr.bf16.mxu0 %v2864_v14 }
 0x9dd   :  { %v658_v35 = vpop.f32.mrf.mxu0 }
 0x9de   :  { %v659_v36 = vadd.f32 %v658_v35, %v620_v34  ;;  %v2322_v35 = vld [vmem:[%s3820_s5 + $0xc] ss:$0 sm:$0xff] }
 0x9df   :  { %v2606_v1 = vpop.f32.mrf.mxu0 }
 0x9e0   :  { %v664_v37 = vpack.c.bf16 %v659_v36, %v659_v36 }
 0x9e1   :  { %v661_v38 = vpop.f32.mrf.mxu0 }
 0x9e2   :  { %2613 = vmatmul.mubr.msk.bf16.vlgmr.msra.gmra.mxu0 %vm98_vm0, %v664_v37  ;;  %v2323_v38 = vld [vmem:[%s3820_s5 + $0xd] ss:$0 sm:$0xff] }
 0x9e3   :  { %v2607_v39 = vpop.f32.mrf.mxu0  ;;  %2618 = vmatprep.mubr.msk.bf16.mxu0 %vm2865_vm1, %v2864_v14 }
 0xaa2   :  { %v708_v43 = vpop.f32.mrf.mxu0 }
 0xaa3   :  { %v709_v44 = vadd.f32 %v2319_v41, %v708_v43 }
 0xaa4   :  { %v2614_v45 = vpop.f32.mrf.mxu0 }
 0xaa5   :  { %v714_v47 = vpack.c.bf16 %v709_v44, %v709_v44  ;;  %v2312_v45 = vld [vmem:[%s3822_s4 + $0xf0] sm:$0xff] }
 0xaa6   :  { %v711_v48 = vpop.f32.mrf.mxu0 }
 0xaa7   :  { %v716_v49 = vsel %vm297_vm12, %v714_v47, 0  ;;  %v2313_v47 = vld [vmem:[%s3822_s4 + $0xf8] sm:$0xff]  ;;  %v2310_v48 = vld [vmem:[%s3822_s4 + $0xe0] sm:$0xff] }
 0xaa8   :  { %v2615_v22 = vpop.f32.mrf.mxu0  ;;  %2617 = vmatpush3.bf16.msra.mxu0 %v716_v49  ;;  %v860_v49 = vpack.c.bf16 %v2313_v47, %v2312_v45 }
 0xaa9   :  { %2630 = vmatprep.subr.bf16.mxu0 %v2864_v14  ;;  %v2311_v22 = vld [vmem:[%s3822_s4 + $0xe8] sm:$0xff] }
 0xaab   :  { %2619 = vmatmul.mubr.msk.bf16.vlgmr.msra.gmra.mxu0 %vm293_vm13, %v3024_v19 }
 0xaac   :  { %2646 = vmatprep.mubr.msk.bf16.mxu0 %vm2865_vm1, %v2864_v14  ;;  %2631 = vmatpush3.bf16.msra.mxu0 %v860_v49 }
 0xaad   :  { %2632 = vmatprep.subr.bf16.mxu0 %v2864_v14 }
 0xb6b   :  { %v752_v50 = vpop.f32.mrf.mxu0 }
 0xb6c   :  { %v3205_v51 = vadd.f32 %v752_v50, %v3133_v40  ;;  %v859_v50 = vpack.c.bf16 %v2311_v22, %v2310_v48 }
 0xb6d   :  { %v2620_v52 = vpop.f32.mrf.mxu0 }
 0xb6e   :  { %v761_v26 = vsel %vm98_vm0, %v3205_v51, 0.0  ;;  %v2308_v52 = vld [vmem:[%s3822_s4 + $0xd0] sm:$0xff]  ;;  %2633 = vmatpush3.bf16.msra.mxu0 %v859_v50 }
 0xb6f   :  { %762 = vadd.xlane.f32.xlu0 %v761_v26  ;;  %v755_v53 = vpop.f32.mrf.mxu0  ;;  %v2309_v26 = vld [vmem:[%s3822_s4 + $0xd8] sm:$0xff]  ;;  %2634 = vmatprep.subr.bf16.mxu0 %v2864_v14 }
 0xb70   :  { %v3210_v54 = vadd.f32 %v755_v53, %v3138_v46  ;;  %v858_v53 = vpack.c.bf16 %v2309_v26, %v2308_v52  ;;  %v2326_v26 = vld [vmem:[%s3820_s5 + $0xe] ss:$0 sm:$0xff] }
 0xb71   :  { %v2621_v55 = vpop.f32.mrf.mxu0 }
 0xb72   :  { %v764_v56 = vsel %vm98_vm0, %v3210_v54, 0.0  ;;  %v2306_v55 = vld [vmem:[%s3822_s4 + $0xc0] sm:$0xff]  ;;  %2635 = vmatpush3.bf16.msra.mxu0 %v858_v53 }
 0xb73   :  { %765 = vadd.xlane.f32.xlu1 %v764_v56  ;;  %v2307_v56 = vld [vmem:[%s3822_s4 + $0xc8] sm:$0xff]  ;;  %2636 = vmatprep.subr.bf16.mxu0 %v2864_v14 }
 0xbf8   :  { %v763_v57 = vpop.xlane.xlu0 %762 }
 0xbf9   :  { %v767_v58 = vmul.f32 0.03125, %v763_v57  ;;  %v857_v57 = vpack.c.bf16 %v2307_v56, %v2306_v55 }
 0xbfb   :  { %v769_v60 = vsub.f32 %v3205_v51, %v767_v58  ;;  %v2304_v58 = vld [vmem:[%s3822_s4 + $0xb0] sm:$0xff]  ;;  %2637 = vmatpush3.bf16.msra.mxu0 %v857_v57 }
 0xbfc   :  { %v766_v40 = vpop.xlane.xlu1 %765  ;;  %2638 = vmatprep.subr.bf16.mxu0 %v2864_v14 }
 0xbfd   :  { %v768_v61 = vmul.f32 0.03125, %v766_v40  ;;  %v771_v62 = vmul.f32 %v769_v60, %v769_v60 }
 0xbff   :  { %v770_v46 = vsub.f32 %v3210_v54, %v768_v61  ;;  %v773_v2 = vsel %vm98_vm0, %v771_v62, 0.0  ;;  %v2302_v61 = vld [vmem:[%s3822_s4 + $0xa0] sm:$0xff]  ;;  %v2303_v62 = vld [vmem:[%s3822_s4 + $0xa8] sm:$0xff] }
 0xc00   :  { %774 = vadd.xlane.f32.xlu0 %v773_v2  ;;  %v2300_v2 = vld [vmem:[%s3822_s4 + $0x90] sm:$0xff] }
 0xc01   :  { %v772_v3 = vmul.f32 %v770_v46, %v770_v46 }
 0xc03   :  { %v776_v6 = vsel %vm98_vm0, %v772_v3, 0.0  ;;  %v2301_v3 = vld [vmem:[%s3822_s4 + $0x98] sm:$0xff] }
 0xc04   :  { %777 = vadd.xlane.f32.xlu1 %v776_v6  ;;  %926 = vadd.xlane.f32.xlu0 %v925_v4  ;;  %v854_v4 = vpack.c.bf16 %v2301_v3, %v2300_v2  ;;  %v2298_v6 = vld [vmem:[%s3822_s4 + $0x80] sm:$0xff] }
 0xc08   :  { %929 = vadd.xlane.f32.xlu1 %v928_v7  ;;  %v2299_v7 = vld [vmem:[%s3822_s4 + $0x88] sm:$0xff] }
 0xc09   :  { %v853_v8 = vpack.c.bf16 %v2299_v7, %v2298_v6 }
 0xc89   :  { %v775_v15 = vpop.xlane.xlu0 %774 }
 0xc8a   :  { %v779_v16 = vmul.f32 0.03125, %v775_v15 }
 0xc8c   :  { %v781_v17 = vadd.f32 1e-05, %v779_v16 }
 0xc8d   :  { %v778_v18 = vpop.xlane.xlu1 %777  ;;  %v927_v20 = vpop.xlane.xlu0 %926 }
 0xc8e   :  { %2840 = vrsqrt.f32 %v781_v17  ;;  %v780_v21 = vmul.f32 0.03125, %v778_v18  ;;  %v931_v23 = vmul.f32 0.03125, %v927_v20  ;;  %v2331_v17 = vld [vmem:[%s3824_s9] ss:$0 sm:$0xff] }
 0xc90   :  { %v782_v24 = vadd.f32 1e-05, %v780_v21  ;;  %v3247_v25 = vsub.f32 %v3218_v63, %v931_v23  ;;  %v2332_v23 = vld [vmem:[%s3824_s9 + $0x1] ss:$0 sm:$0xff] }
 0xc91   :  { %v930_v27 = vpop.xlane.xlu1 %929 }
 0xc92   :  { %2842 = vrsqrt.f32 %v782_v24  ;;  %v932_v28 = vmul.f32 0.03125, %v930_v27  ;;  %v935_v29 = vmul.f32 %v3247_v25, %v3247_v25 }
 0xc94   :  { %v3252_v30 = vsub.f32 %v3227_v5, %v932_v28  ;;  %v937_v31 = vsel %vm98_vm0, %v935_v29, 0.0 }
 0xc95   :  { %938 = vadd.xlane.f32.xlu0 %v937_v31 }
 0xc96   :  { %v936_v0 = vmul.f32 %v3252_v30, %v3252_v30 }
 0xc98   :  { %v940_v32 = vsel %vm98_vm0, %v936_v0, 0.0 }
 0xc99   :  { %941 = vadd.xlane.f32.xlu1 %v940_v32 }
 0xc9b   :  { %v2841_v33 = vpop.eup %2840 }
 0xc9c   :  { %v785_v34 = vmul.f32 %v2841_v33, %v769_v60  ;;  %v2305_v60 = vld [vmem:[%s3822_s4 + $0xb8] sm:$0xff] }
 0xc9d   :  { %v856_v40 = vpack.c.bf16 %v2305_v60, %v2304_v58 }
 0xc9e   :  { %v791_v37 = vmul.f32 %v2322_v35, %v785_v34 }
 0xc9f   :  { %v2843_v36 = vpop.eup %2842  ;;  %2639 = vmatpush3.bf16.msra.mxu0 %v856_v40 }
 0xca0   :  { %v786_v1 = vmul.f32 %v2843_v36, %v770_v46  ;;  %v797_v41 = vadd.f32 %v2323_v38, %v791_v37  ;;  %2640 = vmatprep.subr.bf16.mxu0 %v2864_v14  ;;  %v855_v46 = vpack.c.bf16 %v2303_v62, %v2302_v61 }
 0xca2   :  { %v792_v39 = vmul.f32 %v2322_v35, %v786_v1 }
 0xca3   :  { %2641 = vmatpush3.bf16.msra.mxu0 %v855_v46 }
 0xca4   :  { %v798_v43 = vadd.f32 %v2323_v38, %v792_v39  ;;  %2642 = vmatprep.subr.bf16.mxu0 %v2864_v14  ;;  %v916_v38 = vld [vmem:[%s3825_s6 + $0x10] sm:$0xff]  ;;  %v917_v39 = vld [vmem:[%s3825_s6 + $0x18] sm:$0xff] }
 0xca6   :  { %v799_v44 = vpack.c.bf16 %v798_v43, %v797_v41  ;;  %v914_v41 = vld [vmem:[%s3825_s6] sm:$0xff]  ;;  %v1006_v43 = vpack.c.bf16 %v917_v39, %v916_v38 }
 0xca7   :  { %2643 = vmatpush3.bf16.msra.mxu0 %v854_v4 }
 0xca8   :  { %2627 = vmatmul.mubr.msk.bf16.vlgmr.msra.gmra.mxu1 %vm98_vm0, %v799_v44  ;;  %2644 = vmatprep.subr.bf16.mxu0 %v2864_v14  ;;  %v915_v44 = vld [vmem:[%s3825_s6 + $0x8] sm:$0xff] }
 0xca9   :  { %2652 = vmatprep.mubr.msk.bf16.mxu1 %vm2865_vm1, %v2864_v14  ;;  %v1005_v45 = vpack.c.bf16 %v915_v44, %v914_v41  ;;  %v2414_v44 = vld [vmem:[%s3824_s9 + $0x15] ss:$0 sm:$0xff] }
 0xcab   :  { %2645 = vmatpush3.bf16.msra.mxu0 %v853_v8 }
 0xcac   :  { %2678 = vmatprep.subr.bf16.mxu0 %v2864_v14 }
 0xd1e   :  { %v939_v9 = vpop.xlane.xlu0 %938 }
 0xd1f   :  { %v943_v10 = vmul.f32 0.03125, %v939_v9 }
 0xd21   :  { %v945_v11 = vadd.f32 1e-05, %v943_v10  ;;  %v2329_v10 = vld [vmem:[%s3825_s6 + $0x30] sm:$0xff] }
 0xd22   :  { %v942_v12 = vpop.xlane.xlu1 %941 }
 0xd23   :  { %2844 = vrsqrt.f32 %v945_v11  ;;  %v944_v13 = vmul.f32 0.03125, %v942_v12  ;;  %v2330_v11 = vld [vmem:[%s3825_s6 + $0x38] sm:$0xff] }
 0xd24   :  { %v1057_v12 = vpack.c.bf16 %v2330_v11, %v2329_v10 }
 0xd25   :  { %v946_v15 = vadd.f32 1e-05, %v944_v13  ;;  %v918_v13 = vld [vmem:[%s3824_s9 + $0x2] sm:$0x1] }
 0xd27   :  { %2846 = vrsqrt.f32 %v946_v15  ;;  %v1007_v15 = vmul.f32 8.0, %v918_v13 }
 0xd30   :  { %v2845_v16 = vpop.eup %2844 }
 0xd31   :  { %v949_v18 = vmul.f32 %v2845_v16, %v3247_v25  ;;  %v2324_v25 = vld [vmem:[%s3820_s5 + $0xf] ss:$0 sm:$0xff]  ;;  %v1011_v16 = vrot.slane %v1007_v15, %v3007_v59 }
 0xd33   :  { %v955_v20 = vmul.f32 %v2331_v17, %v949_v18  ;;  %v2328_v18 = vld [vmem:[%s3825_s6 + $0x28] sm:$0xff] }
 0xd34   :  { %v2847_v21 = vpop.eup %2846 }
 0xd35   :  { %v950_v24 = vmul.f32 %v2847_v21, %v3252_v30  ;;  %v961_v28 = vadd.f32 %v2332_v23, %v955_v20 }
 0xd37   :  { %v956_v27 = vmul.f32 %v2331_v17, %v950_v24  ;;  %v2327_v17 = vld [vmem:[%s3825_s6 + $0x20] sm:$0xff] }
 0xd38   :  { %v1056_v21 = vpack.c.bf16 %v2328_v18, %v2327_v17  ;;  %v2342_v18 = vld [vmem:[%s3825_s6 + $0x60] sm:$0xff] }
 0xd39   :  { %v962_v29 = vadd.f32 %v2332_v23, %v956_v27 }
 0xd3b   :  { %v963_v31 = vpack.c.bf16 %v962_v29, %v961_v28 }
 0xd3d   :  { %2651 = vmatpush3.bf16.msra.mxu1 %v963_v31 }
 0xd3e   :  { %2656 = vmatprep.subr.bf16.mxu1 %v2864_v14 }
 0xd40   :  { %2653 = vmatmul.mubr.msk.bf16.vlgmr.msra.gmra.mxu1 %vm142_vm5, %v2972_v42 }
 0xd41   :  { %2660 = vmatprep.mubr.msk.bf16.mxu1 %vm2865_vm1, %v2864_v14  ;;  %2657 = vmatpush3.bf16.msra.mxu1 %v1006_v43  ;;  %v2347_v43 = vld [vmem:[%s3824_s9 + $0x5] ss:$0 sm:$0xff] }
 0xd42   :  { %2658 = vmatprep.subr.bf16.mxu1 %v2864_v14 }
 0xd45   :  { %2659 = vmatpush3.bf16.msra.mxu1 %v1005_v45 }
 0xd46   :  { %2664 = vmatprep.subr.bf16.mxu1 %v2864_v14 }
 0xd68   :  { %v843_v0 = vpop.f32.mrf.mxu1 }
 0xd69   :  { %v844_v30 = vadd.f32 %v2324_v25, %v843_v0 }
 0xd6a   :  { %v2628_v32 = vpop.f32.mrf.mxu1 }
 0xd6b   :  { %v850_v36 = vmax.f32 %v844_v30, 0.0 }
 0xd6c   :  { %v846_v33 = vpop.f32.mrf.mxu1 }
 0xd6d   :  { %v847_v34 = vadd.f32 %v2324_v25, %v846_v33 }
 0xd6e   :  { %v2629_v35 = vpop.f32.mrf.mxu1 }
 0xd6f   :  { %v851_v1 = vmax.f32 %v847_v34, 0.0 }
 0xd71   :  { %v852_v37 = vpack.c.bf16 %v851_v1, %v850_v36  ;;  %v2346_v36 = vld [vmem:[%s3824_s9 + $0x4] ss:$0 sm:$0xff]  ;;  %v2413_v1 = vld [vmem:[%s3824_s9 + $0x14] ss:$0 sm:$0xff] }
 0xd73   :  { %2647 = vmatmul.mubr.bf16.vlgmr.msra.gmra.mxu0 %v852_v37 }
 0xd74   :  { %2680 = vmatprep.mubr.msk.bf16.mxu0 %vm2865_vm1, %v2864_v14 }
 0xe00   :  { %v998_v47 = vpop.f32.mrf.mxu1 }
 0xe01   :  { %v1004_v48 = vpack.c.bf16 %v998_v47, %v998_v47 }
 0xe02   :  { %v2654_v49 = vpop.f32.mrf.mxu1 }
 0xe03   :  { %2661 = vmatmul.mubr.msk.bf16.vlgmr.msra.gmra.mxu1 %vm98_vm0, %v1004_v48 }
 0xe04   :  { %v1001_v22 = vpop.f32.mrf.mxu1  ;;  %2668 = vmatprep.mubr.msk.bf16.mxu1 %vm2865_vm1, %v2864_v14  ;;  %2665 = vmatpush3.bf16.msra.mxu1 %v1057_v12 }
 0xe05   :  { %2666 = vmatprep.subr.bf16.mxu1 %v2864_v14 }
 0xe06   :  { %v2655_v50 = vpop.f32.mrf.mxu1 }
 0xe08   :  { %2667 = vmatpush3.bf16.msra.mxu1 %v1056_v21 }
 0xe09   :  { %2672 = vmatprep.subr.bf16.mxu1 %v2864_v14 }
 0xe33   :  { %v895_v52 = vpop.f32.mrf.mxu0 }
 0xe34   :  { %v902_v53 = vadd.f32 %v895_v52, %v3205_v51 }
 0xe35   :  { %v2648_v55 = vpop.f32.mrf.mxu0 }
 0xe36   :  { %v908_v56 = vadd.f32 %v2326_v26, %v902_v53  ;;  %v2335_v53 = vld [vmem:[%s3824_s9 + $0x3] ss:$0 sm:$0xff] }
 0xe37   :  { %v898_v57 = vpop.f32.mrf.mxu0 }
 0xe38   :  { %v903_v58 = vadd.f32 %v898_v57, %v3210_v54  ;;  %v1190_v60 = vsel %vm98_vm0, %v908_v56, 0.0 }
 0xe39   :  { %1191 = vadd.xlane.f32.xlu0 %v1190_v60  ;;  %v2649_v40 = vpop.f32.mrf.mxu0  ;;  %v2340_v60 = vld [vmem:[%s3825_s6 + $0x50] sm:$0xff] }
 0xe3a   :  { %v909_v61 = vadd.f32 %v2326_v26, %v903_v58  ;;  %v2341_v40 = vld [vmem:[%s3825_s6 + $0x58] sm:$0xff] }
 0xe3c   :  { %v1193_v62 = vsel %vm98_vm0, %v909_v61, 0.0 }
 0xe3d   :  { %1194 = vadd.xlane.f32.xlu1 %v1193_v62 }
 0xec2   :  { %v1192_v46 = vpop.xlane.xlu0 %1191 }
 0xec3   :  { %v1196_v2 = vmul.f32 0.03125, %v1192_v46  ;;  %v1049_v20 = vpop.f32.mrf.mxu1 }
 0xec4   :  { %v1050_v23 = vadd.f32 %v1049_v20, %v1011_v16  ;;  %v2343_v20 = vld [vmem:[%s3825_s6 + $0x68] sm:$0xff] }
 0xec5   :  { %v1198_v3 = vsub.f32 %v908_v56, %v1196_v2  ;;  %v2662_v24 = vpop.f32.mrf.mxu1  ;;  %v1271_v2 = vpack.c.bf16 %v2341_v40, %v2340_v60  ;;  %v1321_v21 = vpack.c.bf16 %v2343_v20, %v2342_v18  ;;  %v1179_v20 = vld [vmem:[%s3827_s8 + $0x30] sm:$0xff] }
 0xec6   :  { %v1195_v4 = vpop.xlane.xlu1 %1194  ;;  %v1055_v27 = vpack.c.bf16 %v1050_v23, %v1050_v23  ;;  %v1159_v23 = vld [vmem:[%s3824_s9 + $0x6] sm:$0x1] }
 0xec7   :  { %v1197_v6 = vmul.f32 0.03125, %v1195_v4  ;;  %v1200_v7 = vmul.f32 %v1198_v3, %v1198_v3  ;;  %v1052_v28 = vpop.f32.mrf.mxu1  ;;  %v2339_v4 = vld [vmem:[%s3825_s6 + $0x48] sm:$0xff]  ;;  %v1272_v24 = vmul.f32 8.0, %v1159_v23 }
 0xec8   :  { %2669 = vmatmul.mubr.msk.bf16.vlgmr.msra.gmra.mxu1 %vm98_vm0, %v1055_v27 }
 0xec9   :  { %v1199_v51 = vsub.f32 %v909_v61, %v1197_v6  ;;  %v1202_v8 = vsel %vm98_vm0, %v1200_v7, 0.0  ;;  %v2663_v29 = vpop.f32.mrf.mxu1  ;;  %2674 = vmatprep.mubr.msk.bf16.mxu1 %vm2865_vm1, %v2864_v14  ;;  %v2344_v7 = vld [vmem:[%s3825_s6 + $0x70] sm:$0xff]  ;;  %v1276_v27 = vrot.slane %v1272_v24, %v3007_v59  ;;  %v1177_v24 = vld [vmem:[%s3827_s8 + $0x20] sm:$0xff] }
 0xeca   :  { %1203 = vadd.xlane.f32.xlu0 %v1202_v8 }
 0xecb   :  { %v1201_v9 = vmul.f32 %v1199_v51, %v1199_v51 }
 0xecd   :  { %v1205_v54 = vsel %vm98_vm0, %v1201_v9, 0.0 }
 0xece   :  { %1206 = vadd.xlane.f32.xlu1 %v1205_v54 }
 0xf53   :  { %v1204_v31 = vpop.xlane.xlu0 %1203 }
 0xf54   :  { %v1208_v25 = vmul.f32 0.03125, %v1204_v31 }
 0xf56   :  { %v1210_v0 = vadd.f32 1e-05, %v1208_v25 }
 0xf57   :  { %v1207_v32 = vpop.xlane.xlu1 %1206 }
 0xf58   :  { %2848 = vrsqrt.f32 %v1210_v0  ;;  %v1209_v30 = vmul.f32 0.03125, %v1207_v32 }
 0xf5a   :  { %v1211_v33 = vadd.f32 1e-05, %v1209_v30  ;;  %v2350_v30 = vld [vmem:[%s3824_s9 + $0x7] ss:$0 sm:$0xff] }
 0xf5c   :  { %2850 = vrsqrt.f32 %v1211_v33 }
 0xf65   :  { %v2849_v34 = vpop.eup %2848 }
 0xf66   :  { %v1214_v35 = vmul.f32 %v2849_v34, %v1198_v3  ;;  %v2338_v3 = vld [vmem:[%s3825_s6 + $0x40] sm:$0xff] }
 0xf67   :  { %v1270_v6 = vpack.c.bf16 %v2339_v4, %v2338_v3  ;;  %v1168_v4 = vld [vmem:[%s3826_s7] sm:$0xff] }
 0xf68   :  { %v1220_v39 = vmul.f32 %v2346_v36, %v1214_v35  ;;  %v1852_v41 = vmul.f32 %v2413_v1, %v1214_v35 }
 0xf69   :  { %v2851_v37 = vpop.eup %2850 }
 0xf6a   :  { %v1215_v38 = vmul.f32 %v2851_v37, %v1199_v51  ;;  %v1226_v48 = vadd.f32 %v2347_v43, %v1220_v39  ;;  %v3400_v22 = vadd.f32 %v2414_v44, %v1852_v41  ;;  %v2345_v51 = vld [vmem:[%s3825_s6 + $0x78] sm:$0xff] }
 0xf6b   :  { %v1322_v8 = vpack.c.bf16 %v2345_v51, %v2344_v7  ;;  %v1187_v51 = vld [vmem:[%s3827_s8 + $0x70] sm:$0xff] }
 0xf6c   :  { %v1221_v45 = vmul.f32 %v2346_v36, %v1215_v38  ;;  %v1853_v47 = vmul.f32 %v2413_v1, %v1215_v38 }
 0xf6e   :  { %v1227_v49 = vadd.f32 %v2347_v43, %v1221_v45  ;;  %v3402_v50 = vadd.f32 %v2414_v44, %v1853_v47 }
 0xf70   :  { %v1228_v52 = vpack.c.bf16 %v1227_v49, %v1226_v48  ;;  %v1860_v26 = vpack.c.bf16 %v3402_v50, %v3400_v22 }
 0xf72   :  { %2679 = vmatpush3.bf16.msra.mxu0 %v1228_v52 }
 0xf73   :  { %2692 = vmatprep.subr.bf16.mxu0 %v2864_v14 }
 0xf75   :  { %2681 = vmatmul.mubr.msk.bf16.vlgmr.msra.gmra.mxu0 %vm142_vm5, %v2972_v42 }
 0xf76   :  { %2696 = vmatprep.mubr.msk.bf16.mxu0 %vm2865_vm1, %v2864_v14  ;;  %2693 = vmatpush3.bf16.msra.mxu0 %v1322_v8  ;;  %v1188_v8 = vld [vmem:[%s3827_s8 + $0x78] sm:$0xff] }
 0xf77   :  { %2694 = vmatprep.subr.bf16.mxu0 %v2864_v14 }
 0xf7a   :  { %2695 = vmatpush3.bf16.msra.mxu0 %v1321_v21  ;;  %v1180_v21 = vld [vmem:[%s3827_s8 + $0x38] sm:$0xff] }
 0xf7b   :  { %2706 = vmatprep.subr.bf16.mxu0 %v2864_v14  ;;  %v1512_v23 = vpack.c.bf16 %v1180_v21, %v1179_v20 }
 0xf88   :  { %v1099_v55 = vpop.f32.mrf.mxu1 }
 0xf89   :  { %v1100_v56 = vadd.f32 %v2335_v53, %v1099_v55 }
 0xf8a   :  { %v2670_v57 = vpop.f32.mrf.mxu1 }
 0xf8b   :  { %v1105_v58 = vpack.c.bf16 %v1100_v56, %v1100_v56 }
 0xf8c   :  { %v1102_v61 = vpop.f32.mrf.mxu1 }
 0xf8d   :  { %v1107_v62 = vsel %vm297_vm12, %v1105_v58, 0 }
 0xf8e   :  { %v2671_v46 = vpop.f32.mrf.mxu1  ;;  %2673 = vmatpush3.bf16.msra.mxu1 %v1107_v62 }
 0xf8f   :  { %2684 = vmatprep.subr.bf16.mxu1 %v2864_v14  ;;  %v1170_v46 = vld [vmem:[%s3826_s7 + $0x10] sm:$0xff] }
 0xf91   :  { %2675 = vmatmul.mubr.msk.bf16.vlgmr.msra.gmra.mxu1 %vm293_vm13, %v3024_v19 }
 0xf92   :  { %2685 = vmatpush3.bf16.msra.mxu1 %v1271_v2  ;;  %2688 = vmatprep.mubr.msk.bf16.mxu1 %vm2865_vm1, %v2864_v14  ;;  %v1171_v2 = vld [vmem:[%s3826_s7 + $0x18] sm:$0xff] }
 0xf93   :  { %2686 = vmatprep.subr.bf16.mxu1 %v2864_v14  ;;  %v1457_v3 = vpack.c.bf16 %v1171_v2, %v1170_v46 }
 0xf96   :  { %2687 = vmatpush3.bf16.msra.mxu1 %v1270_v6  ;;  %v1169_v6 = vld [vmem:[%s3826_s7 + $0x8] sm:$0xff] }
 0xf97   :  { %2700 = vmatprep.subr.bf16.mxu1 %v2864_v14  ;;  %v1456_v7 = vpack.c.bf16 %v1169_v6, %v1168_v4 }
0x1035   :  { %v1263_v9 = vpop.f32.mrf.mxu0 }
0x1036   :  { %v1269_v54 = vpack.c.bf16 %v1263_v9, %v1263_v9  ;;  %v1185_v9 = vld [vmem:[%s3827_s8 + $0x60] sm:$0xff] }
0x1037   :  { %v2682_v10 = vpop.f32.mrf.mxu0 }
0x1038   :  { %2689 = vmatmul.mubr.msk.bf16.vlgmr.msra.gmra.mxu1 %vm98_vm0, %v1269_v54  ;;  %v1516_v54 = vpack.c.bf16 %v1188_v8, %v1187_v51  ;;  %v1186_v10 = vld [vmem:[%s3827_s8 + $0x68] sm:$0xff] }
0x1039   :  { %v1266_v11 = vpop.f32.mrf.mxu0  ;;  %2702 = vmatprep.mubr.msk.bf16.mxu1 %vm2865_vm1, %v2864_v14 }
0x103a   :  { %v1515_v11 = vpack.c.bf16 %v1186_v10, %v1185_v9 }
0x103b   :  { %v2683_v12 = vpop.f32.mrf.mxu0 }
0x103c   :  { %v1183_v12 = vld [vmem:[%s3827_s8 + $0x50] sm:$0xff] }
0x1051   :  { %v1143_v13 = vpop.f32.mrf.mxu1 }
0x1052   :  { %v1150_v39 = vadd.f32 %v1143_v13, %v3218_v63  ;;  %v1184_v13 = vld [vmem:[%s3827_s8 + $0x58] sm:$0xff] }
0x1053   :  { %v2676_v15 = vpop.f32.mrf.mxu1 }
0x1054   :  { %v1514_v15 = vpack.c.bf16 %v1184_v13, %v1183_v12 }
0x1055   :  { %v1146_v16 = vpop.f32.mrf.mxu1 }
0x1056   :  { %v1151_v45 = vadd.f32 %v1146_v16, %v3227_v5  ;;  %v1181_v16 = vld [vmem:[%s3827_s8 + $0x40] sm:$0xff] }
0x1057   :  { %v2677_v17 = vpop.f32.mrf.mxu1 }
0x1058   :  { %v1182_v17 = vld [vmem:[%s3827_s8 + $0x48] sm:$0xff] }
0x1059   :  { %v1513_v18 = vpack.c.bf16 %v1182_v17, %v1181_v16 }
0x10f8   :  { %v1314_v28 = vpop.f32.mrf.mxu1 }
0x10f9   :  { %v1315_v29 = vadd.f32 %v1314_v28, %v1276_v27  ;;  %v1178_v27 = vld [vmem:[%s3827_s8 + $0x28] sm:$0xff] }
0x10fa   :  { %v2690_v31 = vpop.f32.mrf.mxu1  ;;  %v1511_v28 = vpack.c.bf16 %v1178_v27, %v1177_v24 }
0x10fb   :  { %v1320_v25 = vpack.c.bf16 %v1315_v29, %v1315_v29 }
0x10fc   :  { %v1317_v0 = vpop.f32.mrf.mxu1 }
0x10fd   :  { %2697 = vmatmul.mubr.msk.bf16.vlgmr.msra.gmra.mxu0 %vm98_vm0, %v1320_v25 }
0x10fe   :  { %v2691_v32 = vpop.f32.mrf.mxu1  ;;  %2710 = vmatprep.mubr.msk.bf16.mxu0 %vm2865_vm1, %v2864_v14  ;;  %2707 = vmatpush3.bf16.msra.mxu0 %v1457_v3  ;;  %v2357_v3 = vld [vmem:[%s3824_s9 + $0xa] ss:$0 sm:$0xff] }
0x10ff   :  { %2708 = vmatprep.subr.bf16.mxu0 %v2864_v14 }
0x1102   :  { %2709 = vmatpush3.bf16.msra.mxu0 %v1456_v7 }
0x1103   :  { %2734 = vmatprep.subr.bf16.mxu0 %v2864_v14 }
0x11bd   :  { %v1364_v33 = vpop.f32.mrf.mxu0 }
0x11be   :  { %v1365_v34 = vadd.f32 %v2350_v30, %v1364_v33 }
0x11bf   :  { %v2698_v35 = vpop.f32.mrf.mxu0 }
0x11c0   :  { %v1370_v36 = vpack.c.bf16 %v1365_v34, %v1365_v34  ;;  %v2353_v35 = vld [vmem:[%s3824_s9 + $0x8] ss:$0 sm:$0xff] }
0x11c1   :  { %v1367_v1 = vpop.f32.mrf.mxu0 }
0x11c2   :  { %v1372_v37 = vsel %vm297_vm12, %v1370_v36, 0 }
0x11c3   :  { %v2699_v38 = vpop.f32.mrf.mxu0  ;;  %2701 = vmatpush3.bf16.msra.mxu1 %v1372_v37 }
0x11c4   :  { %2714 = vmatprep.subr.bf16.mxu1 %v2864_v14  ;;  %v2354_v38 = vld [vmem:[%s3824_s9 + $0x9] ss:$0 sm:$0xff] }
0x11c6   :  { %2703 = vmatmul.mubr.msk.bf16.vlgmr.msra.gmra.mxu1 %vm293_vm13, %v3024_v19 }
0x11c7   :  { %2730 = vmatprep.mubr.msk.bf16.mxu1 %vm2865_vm1, %v2864_v14  ;;  %2715 = vmatpush3.bf16.msra.mxu1 %v1516_v54 }
0x11c8   :  { %2716 = vmatprep.subr.bf16.mxu1 %v2864_v14 }
0x11cb   :  { %2717 = vmatpush3.bf16.msra.mxu1 %v1515_v11 }
0x11cc   :  { %2718 = vmatprep.subr.bf16.mxu1 %v2864_v14 }
0x11cf   :  { %2719 = vmatpush3.bf16.msra.mxu1 %v1514_v15 }
0x11d0   :  { %2720 = vmatprep.subr.bf16.mxu1 %v2864_v14 }
0x11d3   :  { %2721 = vmatpush3.bf16.msra.mxu1 %v1513_v18 }
0x11d4   :  { %2722 = vmatprep.subr.bf16.mxu1 %v2864_v14 }
0x11d7   :  { %2723 = vmatpush3.bf16.msra.mxu1 %v1512_v23 }
0x11d8   :  { %2724 = vmatprep.subr.bf16.mxu1 %v2864_v14 }
0x11db   :  { %2725 = vmatpush3.bf16.msra.mxu1 %v1511_v28 }
0x11dc   :  { %2726 = vmatprep.subr.bf16.mxu1 %v2864_v14 }
0x1286   :  { %v1408_v41 = vpop.f32.mrf.mxu1 }
0x1287   :  { %v3468_v43 = vadd.f32 %v1408_v41, %v1150_v39 }
0x1288   :  { %v2704_v44 = vpop.f32.mrf.mxu1 }
0x1289   :  { %v1417_v47 = vsel %vm98_vm0, %v3468_v43, 0.0 }
0x128a   :  { %1418 = vadd.xlane.f32.xlu0 %v1417_v47  ;;  %v1411_v48 = vpop.f32.mrf.mxu1  ;;  %v1175_v47 = vld [vmem:[%s3827_s8 + $0x10] sm:$0xff] }
0x128b   :  { %v3473_v49 = vadd.f32 %v1411_v48, %v1151_v45  ;;  %v1176_v48 = vld [vmem:[%s3827_s8 + $0x18] sm:$0xff] }
0x128c   :  { %v2705_v52 = vpop.f32.mrf.mxu1 }
0x128d   :  { %v1420_v53 = vsel %vm98_vm0, %v3473_v49, 0.0  ;;  %v1510_v52 = vpack.c.bf16 %v1176_v48, %v1175_v47  ;;  %v2368_v47 = vld [vmem:[%s3825_s6 + $0xb8] sm:$0xff] }
0x128e   :  { %1421 = vadd.xlane.f32.xlu1 %v1420_v53  ;;  %v1173_v53 = vld [vmem:[%s3827_s8] sm:$0xff] }
0x128f   :  { %2727 = vmatpush3.bf16.msra.mxu1 %v1510_v52 }
0x1290   :  { %2728 = vmatprep.subr.bf16.mxu1 %v2864_v14 }
0x1313   :  { %v1419_v55 = vpop.xlane.xlu0 %1418 }
0x1314   :  { %v1423_v63 = vmul.f32 0.03125, %v1419_v55  ;;  %v1174_v55 = vld [vmem:[%s3827_s8 + $0x8] sm:$0xff] }
0x1316   :  { %v1425_v56 = vsub.f32 %v3468_v43, %v1423_v63  ;;  %v1509_v63 = vpack.c.bf16 %v1174_v55, %v1173_v53 }
0x1317   :  { %v1422_v57 = vpop.xlane.xlu1 %1421 }
0x1318   :  { %v1424_v58 = vmul.f32 0.03125, %v1422_v57  ;;  %v1427_v60 = vmul.f32 %v1425_v56, %v1425_v56  ;;  %2729 = vmatpush3.bf16.msra.mxu1 %v1509_v63 }
0x1319   :  { %2762 = vmatprep.subr.bf16.mxu1 %v2864_v14 }
0x131a   :  { %v1426_v5 = vsub.f32 %v3473_v49, %v1424_v58  ;;  %v1429_v40 = vsel %vm98_vm0, %v1427_v60, 0.0 }
0x131b   :  { %1430 = vadd.xlane.f32.xlu0 %v1429_v40 }
0x131c   :  { %v1428_v61 = vmul.f32 %v1426_v5, %v1426_v5 }
0x131e   :  { %v1432_v62 = vsel %vm98_vm0, %v1428_v61, 0.0 }
0x131f   :  { %1433 = vadd.xlane.f32.xlu1 %v1432_v62 }
0x13a4   :  { %v1431_v29 = vpop.xlane.xlu0 %1430 }
0x13a5   :  { %v1435_v31 = vmul.f32 0.03125, %v1431_v29 }
0x13a7   :  { %v1437_v25 = vadd.f32 1e-05, %v1435_v31 }
0x13a8   :  { %v1434_v0 = vpop.xlane.xlu1 %1433 }
0x13a9   :  { %2852 = vrsqrt.f32 %v1437_v25  ;;  %v1436_v32 = vmul.f32 0.03125, %v1434_v0  ;;  %v2370_v25 = vld [vmem:[%s3824_s9 + $0x10] ss:$0 sm:$0xff] }
0x13ab   :  { %v1438_v30 = vadd.f32 1e-05, %v1436_v32 }
0x13ad   :  { %2854 = vrsqrt.f32 %v1438_v30 }
0x13b6   :  { %v2853_v33 = vpop.eup %2852 }
0x13b7   :  { %v1441_v34 = vmul.f32 %v2853_v33, %v1425_v56  ;;  %v2355_v56 = vld [vmem:[%s3824_s9 + $0xb] ss:$0 sm:$0xff]  ;;  %v2371_v33 = vld [vmem:[%s3824_s9 + $0x11] ss:$0 sm:$0xff] }
0x13b9   :  { %v1447_v37 = vmul.f32 %v2353_v35, %v1441_v34 }
0x13ba   :  { %v2855_v36 = vpop.eup %2854 }
0x13bb   :  { %v1442_v1 = vmul.f32 %v2855_v36, %v1426_v5  ;;  %v1453_v41 = vadd.f32 %v2354_v38, %v1447_v37  ;;  %v2363_v37 = vld [vmem:[%s3825_s6 + $0x98] sm:$0xff] }
0x13bd   :  { %v1448_v39 = vmul.f32 %v2353_v35, %v1442_v1  ;;  %v2362_v1 = vld [vmem:[%s3825_s6 + $0x90] sm:$0xff] }
0x13bf   :  { %v1454_v44 = vadd.f32 %v2354_v38, %v1448_v39  ;;  %v1662_v39 = vpack.c.bf16 %v2363_v37, %v2362_v1 }
0x13c1   :  { %v1455_v45 = vpack.c.bf16 %v1454_v44, %v1453_v41  ;;  %v2360_v41 = vld [vmem:[%s3825_s6 + $0x80] sm:$0xff]  ;;  %v2361_v44 = vld [vmem:[%s3825_s6 + $0x88] sm:$0xff] }
0x13c3   :  { %2711 = vmatmul.mubr.msk.bf16.vlgmr.msra.gmra.mxu0 %vm98_vm0, %v1455_v45  ;;  %v1661_v45 = vpack.c.bf16 %v2361_v44, %v2360_v41 }
0x13c4   :  { %2736 = vmatprep.mubr.msk.bf16.mxu0 %vm2865_vm1, %v2864_v14 }
0x1483   :  { %v1499_v57 = vpop.f32.mrf.mxu0 }
0x1484   :  { %v1500_v60 = vadd.f32 %v2355_v56, %v1499_v57  ;;  %v2365_v57 = vld [vmem:[%s3825_s6 + $0xa0] sm:$0xff] }
0x1485   :  { %v2712_v58 = vpop.f32.mrf.mxu0 }
0x1486   :  { %v1506_v62 = vmax.f32 %v1500_v60, 0.0  ;;  %v2366_v58 = vld [vmem:[%s3825_s6 + $0xa8] sm:$0xff] }
0x1487   :  { %v1502_v5 = vpop.f32.mrf.mxu0  ;;  %v1712_v60 = vpack.c.bf16 %v2366_v58, %v2365_v57 }
0x1488   :  { %v1503_v40 = vadd.f32 %v2355_v56, %v1502_v5  ;;  %v2364_v5 = vld [vmem:[%s3824_s9 + $0x12] sm:$0x1] }
0x1489   :  { %v2713_v61 = vpop.f32.mrf.mxu0 }
0x148a   :  { %v1507_v46 = vmax.f32 %v1503_v40, 0.0  ;;  %v1663_v40 = vmul.f32 8.0, %v2364_v5 }
0x148c   :  { %v1508_v2 = vpack.c.bf16 %v1507_v46, %v1506_v62  ;;  %v1667_v61 = vrot.slane %v1663_v40, %v3007_v59 }
0x148e   :  { %2731 = vmatmul.mubr.bf16.vlgmr.msra.gmra.mxu1 %v1508_v2 }
0x148f   :  { %2763 = vmatpush3.bf16.msra.mxu1 %v1860_v26  ;;  %2764 = vmatprep.mubr.msk.bf16.mxu1 %vm2865_vm1, %v2864_v14 }
0x1490   :  { %2776 = vmatprep.subr.bf16.mxu1 %v2864_v14 }
0x1496   :  { %2765 = vmatmul.mubr.msk.bf16.vlgmr.msra.gmra.mxu1 %vm142_vm5, %v2972_v42 }
0x1497   :  { %2780 = vmatprep.mubr.msk.bf16.mxu1 %vm2865_vm1, %v2864_v14 }
0x154e   :  { %v1551_v4 = vpop.f32.mrf.mxu1 }
0x154f   :  { %v1558_v6 = vadd.f32 %v1551_v4, %v3468_v43 }
0x1550   :  { %v2732_v22 = vpop.f32.mrf.mxu1 }
0x1551   :  { %v3577_v50 = vadd.f32 %v2357_v3, %v1558_v6 }
0x1552   :  { %v1554_v26 = vpop.f32.mrf.mxu1 }
0x1553   :  { %v1559_v7 = vadd.f32 %v1554_v26, %v3473_v49  ;;  %v1581_v51 = vsel %vm98_vm0, %v3577_v50, 0.0 }
0x1554   :  { %1582 = vadd.xlane.f32.xlu0 %v1581_v51  ;;  %v2733_v8 = vpop.f32.mrf.mxu1 }
0x1555   :  { %v3582_v9 = vadd.f32 %v2357_v3, %v1559_v7  ;;  %v2374_v8 = vld [vmem:[%s3824_s9 + $0x13] ss:$0 sm:$0xff] }
0x1556   :  { %v1895_v22 = vpop.f32.mrf.mxu1 }
0x1557   :  { %v1584_v54 = vsel %vm98_vm0, %v3582_v9, 0.0 }
0x1558   :  { %1585 = vadd.xlane.f32.xlu1 %v1584_v54  ;;  %v2766_v26 = vpop.f32.mrf.mxu1 }
0x155a   :  { %v1898_v7 = vpop.f32.mrf.mxu1 }
0x155c   :  { %v2767_v51 = vpop.f32.mrf.mxu1 }
0x155d   :  { %v2393_v51 = vld [vmem:[%s3826_s7 + $0x30] sm:$0xff] }
0x15dd   :  { %v1583_v10 = vpop.xlane.xlu0 %1582 }
0x15de   :  { %v1587_v11 = vmul.f32 0.03125, %v1583_v10 }
0x15e0   :  { %v1589_v43 = vsub.f32 %v3577_v50, %v1587_v11 }
0x15e1   :  { %v1586_v12 = vpop.xlane.xlu1 %1585 }
0x15e2   :  { %v1588_v13 = vmul.f32 0.03125, %v1586_v12  ;;  %v1591_v15 = vmul.f32 %v1589_v43, %v1589_v43  ;;  %v2381_v12 = vld [vmem:[%s3825_s6 + $0xd0] sm:$0xff] }
0x15e4   :  { %v1590_v49 = vsub.f32 %v3582_v9, %v1588_v13  ;;  %v1593_v16 = vsel %vm98_vm0, %v1591_v15, 0.0  ;;  %v2382_v13 = vld [vmem:[%s3825_s6 + $0xd8] sm:$0xff] }
0x15e5   :  { %1594 = vadd.xlane.f32.xlu0 %v1593_v16 }
0x15e6   :  { %v1592_v17 = vmul.f32 %v1590_v49, %v1590_v49 }
0x15e8   :  { %v1596_v18 = vsel %vm98_vm0, %v1592_v17, 0.0  ;;  %v1903_v17 = vpack.c.bf16 %v2382_v13, %v2381_v12  ;;  %v2410_v12 = vld [vmem:[%s3827_s8 + $0xf0] sm:$0xff]  ;;  %v2411_v13 = vld [vmem:[%s3827_s8 + $0xf8] sm:$0xff] }
0x15e9   :  { %1597 = vadd.xlane.f32.xlu1 %v1596_v18  ;;  %v2379_v18 = vld [vmem:[%s3825_s6 + $0xc0] sm:$0xff] }
0x166e   :  { %v1595_v20 = vpop.xlane.xlu0 %1594 }
0x166f   :  { %v1599_v21 = vmul.f32 0.03125, %v1595_v20  ;;  %v2380_v20 = vld [vmem:[%s3825_s6 + $0xc8] sm:$0xff] }
0x1671   :  { %v1601_v23 = vadd.f32 1e-05, %v1599_v21  ;;  %v1902_v21 = vpack.c.bf16 %v2380_v20, %v2379_v18  ;;  %v2406_v18 = vld [vmem:[%s3827_s8 + $0xd0] sm:$0xff]  ;;  %v2407_v20 = vld [vmem:[%s3827_s8 + $0xd8] sm:$0xff] }
0x1672   :  { %v1598_v24 = vpop.xlane.xlu1 %1597 }
0x1673   :  { %2856 = vrsqrt.f32 %v1601_v23  ;;  %v1600_v27 = vmul.f32 0.03125, %v1598_v24  ;;  %v1901_v23 = vpack.c.bf16 %v1895_v22, %v1895_v22  ;;  %v2386_v24 = vld [vmem:[%s3825_s6 + $0xf0] sm:$0xff] }
0x1675   :  { %v1602_v28 = vadd.f32 1e-05, %v1600_v27  ;;  %v2387_v27 = vld [vmem:[%s3825_s6 + $0xf8] sm:$0xff] }
0x1677   :  { %2858 = vrsqrt.f32 %v1602_v28  ;;  %v1954_v28 = vpack.c.bf16 %v2387_v27, %v2386_v24  ;;  %v2405_v24 = vld [vmem:[%s3827_s8 + $0xc8] sm:$0xff] }
0x1679   :  { %2777 = vmatpush3.bf16.msra.mxu1 %v1954_v28  ;;  %v2402_v28 = vld [vmem:[%s3827_s8 + $0xb0] sm:$0xff] }
0x167a   :  { %2778 = vmatprep.subr.bf16.mxu1 %v2864_v14 }
0x1680   :  { %v2857_v29 = vpop.eup %2856 }
0x1681   :  { %v1605_v31 = vmul.f32 %v2857_v29, %v1589_v43  ;;  %v2384_v29 = vld [vmem:[%s3825_s6 + $0xe0] sm:$0xff] }
0x1683   :  { %v1611_v30 = vmul.f32 %v2370_v25, %v1605_v31  ;;  %v2385_v31 = vld [vmem:[%s3825_s6 + $0xe8] sm:$0xff] }
0x1684   :  { %v2859_v0 = vpop.eup %2858 }
0x1685   :  { %v1606_v32 = vmul.f32 %v2859_v0, %v1590_v49  ;;  %v1617_v35 = vadd.f32 %v2371_v33, %v1611_v30  ;;  %v2383_v0 = vld [vmem:[%s3824_s9 + $0x16] sm:$0x1] }
0x1686   :  { %v1904_v30 = vmul.f32 8.0, %v2383_v0 }
0x1687   :  { %v1612_v34 = vmul.f32 %v2370_v25, %v1606_v32  ;;  %v1953_v25 = vpack.c.bf16 %v2385_v31, %v2384_v29  ;;  %v2403_v29 = vld [vmem:[%s3827_s8 + $0xb8] sm:$0xff] }
0x1688   :  { %v2144_v31 = vpack.c.bf16 %v2403_v29, %v2402_v28 }
0x1689   :  { %v1618_v36 = vadd.f32 %v2371_v33, %v1612_v34  ;;  %2779 = vmatpush3.bf16.msra.mxu1 %v1953_v25 }
0x168a   :  { %2790 = vmatprep.subr.bf16.mxu1 %v2864_v14 }
0x168b   :  { %v1619_v38 = vpack.c.bf16 %v1618_v36, %v1617_v35  ;;  %v1908_v35 = vrot.slane %v1904_v30, %v3007_v59 }
0x168d   :  { %2735 = vmatpush3.bf16.msra.mxu0 %v1619_v38 }
0x168e   :  { %2740 = vmatprep.subr.bf16.mxu0 %v2864_v14 }
0x1690   :  { %2737 = vmatmul.mubr.msk.bf16.vlgmr.msra.gmra.mxu0 %vm142_vm5, %v2972_v42  ;;  %v2367_v42 = vld [vmem:[%s3825_s6 + $0xb0] sm:$0xff] }
0x1691   :  { %2741 = vmatpush3.bf16.msra.mxu0 %v1662_v39  ;;  %2744 = vmatprep.mubr.msk.bf16.mxu0 %vm2865_vm1, %v2864_v14  ;;  %v1713_v52 = vpack.c.bf16 %v2368_v47, %v2367_v42 }
0x1692   :  { %2742 = vmatprep.subr.bf16.mxu0 %v2864_v14 }
0x1695   :  { %2743 = vmatpush3.bf16.msra.mxu0 %v1661_v45  ;;  %v2417_v45 = vld [vmem:[%s3824_s9 + $0x17] ss:$0 sm:$0xff] }
0x1696   :  { %2748 = vmatprep.subr.bf16.mxu0 %v2864_v14 }
0x1750   :  { %v1654_v48 = vpop.f32.mrf.mxu0 }
0x1751   :  { %v1660_v53 = vpack.c.bf16 %v1654_v48, %v1654_v48 }
0x1752   :  { %v2738_v55 = vpop.f32.mrf.mxu0 }
0x1753   :  { %2745 = vmatmul.mubr.msk.bf16.vlgmr.msra.gmra.mxu0 %vm98_vm0, %v1660_v53 }
0x1754   :  { %v1657_v63 = vpop.f32.mrf.mxu0  ;;  %2749 = vmatpush3.bf16.msra.mxu0 %v1713_v52  ;;  %2752 = vmatprep.mubr.msk.bf16.mxu0 %vm2865_vm1, %v2864_v14 }
0x1755   :  { %2750 = vmatprep.subr.bf16.mxu0 %v2864_v14 }
0x1756   :  { %v2739_v56 = vpop.f32.mrf.mxu0 }
0x1758   :  { %2751 = vmatpush3.bf16.msra.mxu0 %v1712_v60 }
0x1759   :  { %2756 = vmatprep.subr.bf16.mxu0 %v2864_v14 }
0x1813   :  { %v1705_v62 = vpop.f32.mrf.mxu0 }
0x1814   :  { %v1706_v46 = vadd.f32 %v1705_v62, %v1667_v61 }
0x1815   :  { %v2746_v2 = vpop.f32.mrf.mxu0 }
0x1816   :  { %v1711_v3 = vpack.c.bf16 %v1706_v46, %v1706_v46 }
0x1817   :  { %v1708_v4 = vpop.f32.mrf.mxu0 }
0x1818   :  { %2753 = vmatmul.mubr.msk.bf16.vlgmr.msra.gmra.mxu0 %vm98_vm0, %v1711_v3 }
0x1819   :  { %v2747_v6 = vpop.f32.mrf.mxu0  ;;  %2758 = vmatprep.mubr.msk.bf16.mxu0 %vm2865_vm1, %v2864_v14 }
0x18d8   :  { %v1755_v54 = vpop.f32.mrf.mxu0 }
0x18d9   :  { %v1756_v10 = vadd.f32 %v2374_v8, %v1755_v54  ;;  %v2394_v8 = vld [vmem:[%s3826_s7 + $0x38] sm:$0xff] }
0x18da   :  { %v2754_v11 = vpop.f32.mrf.mxu0  ;;  %v2089_v54 = vpack.c.bf16 %v2394_v8, %v2393_v51  ;;  %v2199_v51 = vld [vmem:[%s3828_s10 + $0x8] sm:$0xff] }
0x18db   :  { %v1761_v43 = vpack.c.bf16 %v1756_v10, %v1756_v10  ;;  %v2391_v10 = vld [vmem:[%s3826_s7 + $0x20] sm:$0xff]  ;;  %v2392_v11 = vld [vmem:[%s3826_s7 + $0x28] sm:$0xff] }
0x18dc   :  { %v1758_v15 = vpop.f32.mrf.mxu0 }
0x18dd   :  { %v1763_v49 = vsel %vm297_vm12, %v1761_v43, 0  ;;  %v2088_v43 = vpack.c.bf16 %v2392_v11, %v2391_v10  ;;  %v2408_v15 = vld [vmem:[%s3827_s8 + $0xe0] sm:$0xff] }
0x18de   :  { %v2755_v16 = vpop.f32.mrf.mxu0  ;;  %2757 = vmatpush3.bf16.msra.mxu0 %v1763_v49  ;;  %v2148_v49 = vpack.c.bf16 %v2411_v13, %v2410_v12 }
0x18df   :  { %2768 = vmatprep.subr.bf16.mxu0 %v2864_v14  ;;  %v2409_v16 = vld [vmem:[%s3827_s8 + $0xe8] sm:$0xff] }
0x18e1   :  { %2759 = vmatmul.mubr.msk.bf16.vlgmr.msra.gmra.mxu0 %vm293_vm13, %v3024_v19 }
0x18e2   :  { %2769 = vmatpush3.bf16.msra.mxu0 %v1903_v17  ;;  %2772 = vmatprep.mubr.msk.bf16.mxu0 %vm2865_vm1, %v2864_v14  ;;  %v2147_v17 = vpack.c.bf16 %v2409_v16, %v2408_v15 }
0x18e3   :  { %2770 = vmatprep.subr.bf16.mxu0 %v2864_v14 }
0x18e6   :  { %2771 = vmatpush3.bf16.msra.mxu0 %v1902_v21  ;;  %v2146_v21 = vpack.c.bf16 %v2407_v20, %v2406_v18 }
0x18e7   :  { %2784 = vmatprep.subr.bf16.mxu0 %v2864_v14 }
0x18e9   :  { %2773 = vmatmul.mubr.msk.bf16.vlgmr.msra.gmra.mxu0 %vm98_vm0, %v1901_v23  ;;  %v2404_v23 = vld [vmem:[%s3827_s8 + $0xc0] sm:$0xff] }
0x18ea   :  { %2786 = vmatprep.mubr.msk.bf16.mxu0 %vm2865_vm1, %v2864_v14  ;;  %v2145_v27 = vpack.c.bf16 %v2405_v24, %v2404_v23 }
0x19a1   :  { %v1799_v32 = vpop.f32.mrf.mxu0 }
0x19a2   :  { %v1806_v63 = vadd.f32 %v1799_v32, %v3577_v50 }
0x19a3   :  { %v2760_v33 = vpop.f32.mrf.mxu0 }
0x19a5   :  { %v1802_v34 = vpop.f32.mrf.mxu0 }
0x19a6   :  { %v1807_v60 = vadd.f32 %v1802_v34, %v3582_v9 }
0x19a7   :  { %v2761_v36 = vpop.f32.mrf.mxu0 }
0x19a9   :  { %v1946_v1 = vpop.f32.mrf.mxu0 }
0x19aa   :  { %v1947_v37 = vadd.f32 %v1946_v1, %v1908_v35  ;;  %v2420_v1 = vld [vmem:[%s3824_s9 + $0x18] ss:$0 sm:$0xff] }
0x19ab   :  { %v2774_v38 = vpop.f32.mrf.mxu0 }
0x19ac   :  { %v1952_v39 = vpack.c.bf16 %v1947_v37, %v1947_v37 }
0x19ad   :  { %v1949_v41 = vpop.f32.mrf.mxu0 }
0x19ae   :  { %2781 = vmatmul.mubr.msk.bf16.vlgmr.msra.gmra.mxu1 %vm98_vm0, %v1952_v39  ;;  %v2421_v41 = vld [vmem:[%s3824_s9 + $0x19] ss:$0 sm:$0xff] }
0x19af   :  { %v2775_v44 = vpop.f32.mrf.mxu0  ;;  %2794 = vmatprep.mubr.msk.bf16.mxu1 %vm2865_vm1, %v2864_v14  ;;  %2791 = vmatpush3.bf16.msra.mxu1 %v2089_v54 }
0x19b0   :  { %2792 = vmatprep.subr.bf16.mxu1 %v2864_v14 }
0x19b3   :  { %2793 = vmatpush3.bf16.msra.mxu1 %v2088_v43  ;;  %v2424_v43 = vld [vmem:[%s3824_s9 + $0x1a] ss:$0 sm:$0xff] }
0x19b4   :  { %2818 = vmatprep.subr.bf16.mxu1 %v2864_v14 }
0x1a6e   :  { %v1996_v42 = vpop.f32.mrf.mxu1 }
0x1a6f   :  { %v1997_v47 = vadd.f32 %v2417_v45, %v1996_v42 }
0x1a70   :  { %v2782_v48 = vpop.f32.mrf.mxu1 }
0x1a71   :  { %v2002_v59 = vpack.c.bf16 %v1997_v47, %v1997_v47  ;;  %v2400_v48 = vld [vmem:[%s3827_s8 + $0xa0] sm:$0xff] }
0x1a72   :  { %v1999_v52 = vpop.f32.mrf.mxu1 }
0x1a73   :  { %v2004_v53 = vsel %vm297_vm12, %v2002_v59, 0  ;;  %v2401_v59 = vld [vmem:[%s3827_s8 + $0xa8] sm:$0xff] }
0x1a74   :  { %v2783_v55 = vpop.f32.mrf.mxu1  ;;  %2785 = vmatpush3.bf16.msra.mxu0 %v2004_v53  ;;  %v2143_v52 = vpack.c.bf16 %v2401_v59, %v2400_v48  ;;  %v2398_v53 = vld [vmem:[%s3827_s8 + $0x90] sm:$0xff] }
0x1a75   :  { %2798 = vmatprep.subr.bf16.mxu0 %v2864_v14  ;;  %v2399_v55 = vld [vmem:[%s3827_s8 + $0x98] sm:$0xff] }
0x1a77   :  { %2787 = vmatmul.mubr.msk.bf16.vlgmr.msra.gmra.mxu0 %vm293_vm13, %v3024_v19 }
0x1a78   :  { %2814 = vmatprep.mubr.msk.bf16.mxu0 %vm2865_vm1, %v2864_v14  ;;  %2799 = vmatpush3.bf16.msra.mxu0 %v2148_v49 }
0x1a79   :  { %2800 = vmatprep.subr.bf16.mxu0 %v2864_v14 }
0x1a7c   :  { %2801 = vmatpush3.bf16.msra.mxu0 %v2147_v17  ;;  %v2425_v17 = vld [vmem:[%s3828_s10 + $0x20] ss:$0 sm:$0xff] }
0x1a7d   :  { %2802 = vmatprep.subr.bf16.mxu0 %v2864_v14 }
0x1a80   :  { %2803 = vmatpush3.bf16.msra.mxu0 %v2146_v21 }
0x1a81   :  { %2804 = vmatprep.subr.bf16.mxu0 %v2864_v14 }
0x1a84   :  { %2805 = vmatpush3.bf16.msra.mxu0 %v2145_v27 }
0x1a85   :  { %2806 = vmatprep.subr.bf16.mxu0 %v2864_v14 }
0x1a88   :  { %2807 = vmatpush3.bf16.msra.mxu0 %v2144_v31 }
0x1a89   :  { %2808 = vmatprep.subr.bf16.mxu0 %v2864_v14 }
0x1a8c   :  { %2809 = vmatpush3.bf16.msra.mxu0 %v2143_v52 }
0x1a8d   :  { %2810 = vmatprep.subr.bf16.mxu0 %v2864_v14 }
0x1b37   :  { %v2040_v56 = vpop.f32.mrf.mxu0 }
0x1b38   :  { %v3696_v57 = vadd.f32 %v2040_v56, %v1806_v63  ;;  %v2142_v63 = vpack.c.bf16 %v2399_v55, %v2398_v53  ;;  %v2396_v56 = vld [vmem:[%s3827_s8 + $0x80] sm:$0xff] }
0x1b39   :  { %v2788_v58 = vpop.f32.mrf.mxu0 }
0x1b3a   :  { %v2049_v5 = vsel %vm98_vm0, %v3696_v57, 0.0  ;;  %2811 = vmatpush3.bf16.msra.mxu0 %v2142_v63  ;;  %v2397_v58 = vld [vmem:[%s3827_s8 + $0x88] sm:$0xff] }
0x1b3b   :  { %2050 = vadd.xlane.f32.xlu0 %v2049_v5  ;;  %v2043_v40 = vpop.f32.mrf.mxu0  ;;  %2812 = vmatprep.subr.bf16.mxu0 %v2864_v14  ;;  %v2422_v5 = vld [vmem:[%s3824_s9 + $0x1b] ss:$0 sm:$0xff] }
0x1b3c   :  { %v3701_v61 = vadd.f32 %v2043_v40, %v1807_v60  ;;  %v2141_v60 = vpack.c.bf16 %v2397_v58, %v2396_v56 }
0x1b3d   :  { %v2789_v62 = vpop.f32.mrf.mxu0 }
0x1b3e   :  { %v2052_v19 = vsel %vm98_vm0, %v3701_v61, 0.0  ;;  %2813 = vmatpush3.bf16.msra.mxu0 %v2141_v60 }
0x1b3f   :  { %2053 = vadd.xlane.f32.xlu1 %v2052_v19 }
0x1bc4   :  { %v2051_v46 = vpop.xlane.xlu0 %2050 }
0x1bc5   :  { %v2055_v50 = vmul.f32 0.03125, %v2051_v46 }
0x1bc7   :  { %v2057_v2 = vsub.f32 %v3696_v57, %v2055_v50 }
0x1bc8   :  { %v2054_v3 = vpop.xlane.xlu1 %2053 }
0x1bc9   :  { %v2056_v4 = vmul.f32 0.03125, %v2054_v3  ;;  %v2059_v6 = vmul.f32 %v2057_v2, %v2057_v2 }
0x1bcb   :  { %v2058_v9 = vsub.f32 %v3701_v61, %v2056_v4  ;;  %v2061_v22 = vsel %vm98_vm0, %v2059_v6, 0.0 }
0x1bcc   :  { %2062 = vadd.xlane.f32.xlu0 %v2061_v22  ;;  %v2201_v22 = vld [vmem:[%s3828_s10 + $0x18] sm:$0xff] }
0x1bcd   :  { %v2060_v26 = vmul.f32 %v2058_v9, %v2058_v9 }
0x1bcf   :  { %v2064_v7 = vsel %vm98_vm0, %v2060_v26, 0.0 }
0x1bd0   :  { %2065 = vadd.xlane.f32.xlu1 %v2064_v7  ;;  %v2198_v7 = vld [vmem:[%s3828_s10] sm:$0xff] }
0x1bd1   :  { %v2203_v8 = vpack.c.bf16 %v2199_v51, %v2198_v7 }
0x1c55   :  { %v2063_v25 = vpop.xlane.xlu0 %2062 }
0x1c56   :  { %v2067_v0 = vmul.f32 0.03125, %v2063_v25 }
0x1c58   :  { %v2069_v32 = vadd.f32 1e-05, %v2067_v0 }
0x1c59   :  { %v2066_v30 = vpop.xlane.xlu1 %2065 }
0x1c5a   :  { %2860 = vrsqrt.f32 %v2069_v32  ;;  %v2068_v33 = vmul.f32 0.03125, %v2066_v30 }
0x1c5c   :  { %v2070_v34 = vadd.f32 1e-05, %v2068_v33 }
0x1c5e   :  { %2862 = vrsqrt.f32 %v2070_v34 }
0x1c67   :  { %v2861_v35 = vpop.eup %2860 }
0x1c68   :  { %v2073_v36 = vmul.f32 %v2861_v35, %v2057_v2 }
0x1c6a   :  { %v2079_v39 = vmul.f32 %v2420_v1, %v2073_v36 }
0x1c6b   :  { %v2863_v37 = vpop.eup %2862 }
0x1c6c   :  { %v2074_v38 = vmul.f32 %v2863_v37, %v2058_v9  ;;  %v2085_v45 = vadd.f32 %v2421_v41, %v2079_v39  ;;  %v2200_v9 = vld [vmem:[%s3828_s10 + $0x10] sm:$0xff] }
0x1c6d   :  { %v2204_v26 = vpack.c.bf16 %v2201_v22, %v2200_v9 }
0x1c6e   :  { %v2080_v44 = vmul.f32 %v2420_v1, %v2074_v38 }
0x1c70   :  { %v2086_v42 = vadd.f32 %v2421_v41, %v2080_v44 }
0x1c72   :  { %v2087_v47 = vpack.c.bf16 %v2086_v42, %v2085_v45 }
0x1c74   :  { %2795 = vmatmul.mubr.msk.bf16.vlgmr.msra.gmra.mxu1 %vm98_vm0, %v2087_v47 }
0x1c75   :  { %2822 = vmatprep.mubr.msk.bf16.mxu1 %vm2865_vm1, %v2864_v14  ;;  %2819 = vmatpush3.bf16.msra.mxu1 %v2204_v26 }
0x1c76   :  { %2820 = vmatprep.subr.bf16.mxu1 %v2864_v14 }
0x1c79   :  { %2821 = vmatpush3.bf16.msra.mxu1 %v2203_v8 }
0x1d34   :  { %v2131_v40 = vpop.f32.mrf.mxu1 }
0x1d35   :  { %v2132_v19 = vadd.f32 %v2422_v5, %v2131_v40 }
0x1d36   :  { %v2796_v62 = vpop.f32.mrf.mxu1 }
0x1d37   :  { %v2138_v3 = vmax.f32 %v2132_v19, 0.0 }
0x1d38   :  { %v2134_v46 = vpop.f32.mrf.mxu1 }
0x1d39   :  { %v2135_v50 = vadd.f32 %v2422_v5, %v2134_v46 }
0x1d3a   :  { %v2797_v2 = vpop.f32.mrf.mxu1 }
0x1d3b   :  { %v2139_v4 = vmax.f32 %v2135_v50, 0.0 }
0x1d3d   :  { %v2140_v6 = vpack.c.bf16 %v2139_v4, %v2138_v3 }
0x1d3f   :  { %2815 = vmatmul.mubr.bf16.vlgmr.msra.gmra.mxu0 %v2140_v6 }
0x1dff   :  { %v2183_v54 = vpop.f32.mrf.mxu0 }
0x1e00   :  { %v2190_v11 = vadd.f32 %v2183_v54, %v3696_v57 }
0x1e01   :  { %v2816_v10 = vpop.f32.mrf.mxu0 }
0x1e02   :  { %v2196_v15 = vadd.f32 %v2424_v43, %v2190_v11 }
0x1e03   :  { %v2186_v12 = vpop.f32.mrf.mxu0 }
0x1e04   :  { %v2191_v14 = vadd.f32 %v2186_v12, %v3701_v61 }
0x1e05   :  { %v2817_v13 = vpop.f32.mrf.mxu0 }
0x1e06   :  { %v2197_v49 = vadd.f32 %v2424_v43, %v2191_v14 }
0x1e08   :  { %v2202_v16 = vpack.c.bf16 %v2197_v49, %v2196_v15 }
0x1e0a   :  { %2823 = vmatmul.mubr.msk.bf16.vlgmr.msra.gmra.mxu1 %vm98_vm0, %v2202_v16 }
0x1eca   :  { %v2247_v18 = vpop.f32.mrf.mxu1 }
0x1ecb   :  { %v2248_v20 = vadd.f32 %v2425_v17, %v2247_v18 }
0x1ecc   :  { %v2824_v57 = vpop.f32.mrf.mxu1 }
0x1ecd   :  { %2254 = vst [vmem:[%s3829_s11] sm:$0xff] %v2248_v20 }
0x1ece   :  { %v2250_v21 = vpop.f32.mrf.mxu1 }
0x1ecf   :  { %v2251_v23 = vadd.f32 %v2425_v17, %v2250_v21 }
0x1ed0   :  { %v2825_v61 = vpop.f32.mrf.mxu1 }
0x1ed1   :  { %2255 = vst [vmem:[%s3829_s11 + $0x8] sm:$0xff] %v2251_v23 }

</bundles_post_ra>
